<compile_context>
chip_gen: v7x
topology: tpu7x:2x2x1
jax: 0.10.0
libtpu: 0.0.40
codegen_flags: <defaults>
</compile_context>

<pallas_src>
import functools
import math

import jax
import jax.numpy as jnp
from jax.experimental import pallas as pl
from jax.experimental.pallas import tpu as pltpu


def _round_up(x, m):
    return (x + m - 1) // m * m


def _actor_kernel(x_ref, noise_ref,
                  w1_ref, b1_ref, w2_ref, b2_ref, w3_ref, b3_ref,
                  out_ref, *, action_dim, head, log_std_min, log_std_max):
    """Fused trunk MLP + tanh-Gaussian policy head for one batch tile."""
    A = action_dim
    HD = head                              # padded head width (multiple of 128)

    # Trunk MLP: bf16 operands on the MXU, f32 accumulation.
    x = x_ref[...].astype(jnp.bfloat16)
    h = jnp.dot(x, w1_ref[...], preferred_element_type=jnp.float32) + b1_ref[...]
    h = jnp.maximum(h, 0.0).astype(jnp.bfloat16)
    h = jnp.dot(h, w2_ref[...], preferred_element_type=jnp.float32) + b2_ref[...]
    h = jnp.maximum(h, 0.0).astype(jnp.bfloat16)
    t = jnp.dot(h, w3_ref[...], preferred_element_type=jnp.float32) + b3_ref[...]

    # Heads are vreg-aligned: mu head in lanes [0, HD), log_std head in
    # [HD, 2*HD); only the first A lanes of each head are real.
    mu = t[:, :HD]
    log_std = jnp.tanh(t[:, HD:])
    log_std = log_std_min + 0.5 * (log_std_max - log_std_min) * (log_std + 1.0)

    # Reparameterised sample (noise supplied by the wrapper, zero in padded
    # lanes; matches torch.randn_like semantics on the real lanes).
    noise = noise_ref[...]
    std = jnp.exp(log_std)
    pi = mu + noise * std

    # Lane mask: padded head lanes must not enter the reductions (their
    # log_std is the midpoint of [log_std_min, log_std_max], not 0).
    lane = jax.lax.broadcasted_iota(jnp.int32, (mu.shape[0], HD), 1)
    valid = lane < A

    # Gaussian log-probability over the real A lanes.
    g = jnp.where(valid, -0.5 * noise * noise - log_std, 0.0)
    log_pi = jnp.sum(g, axis=-1, keepdims=True)
    log_pi = log_pi - 0.5 * math.log(2.0 * math.pi) * A

    # Squash (tanh) + log-prob correction, masked to the real lanes.
    mu_s = jnp.tanh(mu)
    pi_s = jnp.tanh(pi)
    corr = jnp.where(
        valid, jnp.log(jnp.maximum(1.0 - pi_s * pi_s, 0.0) + 1e-6), 0.0)
    log_pi = log_pi - jnp.sum(corr, axis=-1, keepdims=True)

    # Lane-dense output slab: four 128-aligned segments -> unmasked stores.
    out_ref[:, 0 * HD:1 * HD] = mu_s
    out_ref[:, 1 * HD:2 * HD] = pi_s
    out_ref[:, 2 * HD:3 * HD] = log_std
    out_ref[:, 3 * HD:4 * HD] = jnp.broadcast_to(log_pi, (mu_s.shape[0], HD))


def actor_forward(obs, noise, params, *, log_std_min, log_std_max, tile_b=512):
    """Actor.forward (identity encoder, compute_pi=compute_log_pi=True).

    Returns (mu, pi, log_pi, log_std): (B, A), (B, A), (B, 1), (B, A).
    """
    obs = obs.astype(jnp.float32)
    noise = noise.astype(jnp.float32)
    assert obs.shape[0] == noise.shape[0]

    B, obs_dim = obs.shape
    A = noise.shape[1]
    H = params["w1"].shape[1]
    HD = params["w3"].shape[1] // 2          # lane-padded head width
    assert HD % 128 == 0 and A <= HD
    out_w = 4 * HD

    # Pad the noise lanes A -> HD with zeros (tiny vs obs; padded lanes are
    # masked inside the kernel anyway). Keeps the noise tile lane-dense.
    if A != HD:
        noise = jnp.pad(noise, ((0, 0), (0, HD - A)))

    # Batch tile: multiple of 16 (bf16 sublane pairing) and capped so the
    # grid has >= 2 steps whenever B allows (v7x: 2 TensorCores share work
    # only across grid steps).
    # TODO(synk): on v6e (128 MiB VMEM) tile_b=1024-2048 is slightly better
    #             for very large batches; 512 is the safe cross-gen default.
    tile_b = max(16, min(tile_b, _round_up(pl.cdiv(B, 2), 16)))
    grid = (pl.cdiv(B, tile_b),)
    # NOTE: no jnp.pad of the batch; the partial last block's tail rows
    # compute on undefined data and are discarded (never written back).

    kernel = functools.partial(
        _actor_kernel, action_dim=A, head=HD,
        log_std_min=float(log_std_min), log_std_max=float(log_std_max))

    weight_elems = obs_dim * H + H * H + H * 2 * HD
    bias_elems = H + H + 2 * HD
    cost = pl.CostEstimate(
        flops=2 * B * weight_elems,
        transcendentals=5 * B * HD,                    # tanh x3, exp, log
        bytes_accessed=4 * B * (obs_dim + HD + out_w)
        + 2 * weight_elems + 4 * bias_elems)

    # VMEM budget: resident bf16 weights + double-buffered batch tiles + live
    # f32 activations.  >= 32 MiB (lifts v5e's 16 MiB default scoped limit),
    # capped at 64 MiB (v7x physical VMEM).
    est = (2 * (2 * weight_elems + 4 * bias_elems)
           + 2 * tile_b * 4 * (obs_dim + HD + out_w)
           + 2 * tile_b * H * 4)
    vmem_limit = int(min(64 * 2 ** 20, max(32 * 2 ** 20, 3 * est // 2)))

    def run(single_buffer_weights):
        res_kw = (dict(pipeline_mode=pl.Buffered(1))
                  if single_buffer_weights else {})

        def resident(shape):
            # Same block every grid step -> stays VMEM-resident; single
            # buffer (no point double-buffering a never-changing block).
            return pl.BlockSpec(shape, lambda i: (0, 0), **res_kw)

        return pl.pallas_call(
            kernel,
            out_shape=jax.ShapeDtypeStruct((B, out_w), jnp.float32),
            grid=grid,
            in_specs=[
                pl.BlockSpec((tile_b, obs_dim), lambda i: (i, 0)),   # obs tile
                pl.BlockSpec((tile_b, HD), lambda i: (i, 0)),        # noise tile
                resident(params["w1"].shape), resident(params["b1"].shape),
                resident(params["w2"].shape), resident(params["b2"].shape),
                resident(params["w3"].shape), resident(params["b3"].shape),
            ],
            out_specs=pl.BlockSpec((tile_b, out_w), lambda i: (i, 0)),
            compiler_params=pltpu.CompilerParams(
                dimension_semantics=("parallel",),
                vmem_limit_bytes=vmem_limit),
            cost_estimate=cost,
        )(obs, noise,
          params["w1"], params["b1"], params["w2"], params["b2"],
          params["w3"], params["b3"])

    try:
        out = run(True)
    except Exception:
        # pipeline_mode=pl.Buffered(1) not supported by this jax version;
        # fall back to default (double-buffered) resident weights.
        out = run(False)

    mu = out[:, :A]
    pi = out[:, HD:HD + A]
    log_std = out[:, 2 * HD:2 * HD + A]
    log_pi = out[:, 3 * HD:3 * HD + 1]
    return mu, pi, log_pi, log_std


def _init_linear(key, fan_in, fan_out):
    """PyTorch nn.Linear default init: U(-1/sqrt(fan_in), 1/sqrt(fan_in)).

    Weights stored (in_features, out_features) so y = x @ W + b; biases as
    (1, out_features) for TPU-friendly 2-D broadcasting.
    """
    kw, kb = jax.random.split(key)
    bound = 1.0 / math.sqrt(float(fan_in))
    w = jax.random.uniform(kw, (fan_in, fan_out), jnp.float32, -bound, bound)
    b = jax.random.uniform(kb, (1, fan_out), jnp.float32, -bound, bound)
    return w, b


def init_actor_params(key, obs_dim, action_dim, hidden_dim):
    """Weights stored bf16 (MXU-native), biases f32; w3/b3 lane-padded."""
    HD = _round_up(max(action_dim, 1), 128)   # lane-dense head width
    k1, k2, k3 = jax.random.split(key, 3)
    w1, b1 = _init_linear(k1, obs_dim, hidden_dim)
    w2, b2 = _init_linear(k2, hidden_dim, hidden_dim)
    w3r, b3r = _init_linear(k3, hidden_dim, 2 * action_dim)
    # Scatter the real head columns into a lane-dense (H, 2*HD) layout:
    # mu head -> lanes [0, A), log_std head -> lanes [HD, HD+A); padded lanes
    # are zero and masked out of the in-kernel reductions.
    w3 = jnp.zeros((hidden_dim, 2 * HD), jnp.float32)
    w3 = w3.at[:, :action_dim].set(w3r[:, :action_dim])
    w3 = w3.at[:, HD:HD + action_dim].set(w3r[:, action_dim:])
    b3 = jnp.zeros((1, 2 * HD), jnp.float32)
    b3 = b3.at[:, :action_dim].set(b3r[:, :action_dim])
    b3 = b3.at[:, HD:HD + action_dim].set(b3r[:, action_dim:])
    # TODO(synk): optional obs_dim/hidden_dim 128-padding at init and the
    #             v7x-only fp8 path for the H*H layer are not implemented.
    return {"w1": w1.astype(jnp.bfloat16), "b1": b1,
            "w2": w2.astype(jnp.bfloat16), "b2": b2,
            "w3": w3.astype(jnp.bfloat16), "b3": b3}


def _actor_forward_ref(obs, noise, params, *, log_std_min, log_std_max):
    """Pure-JAX reference of the same math (same bf16 weights / head layout)."""
    A = noise.shape[1]
    HD = params["w3"].shape[1] // 2
    x = obs.astype(jnp.bfloat16)
    h = jnp.maximum(
        jnp.dot(x, params["w1"], preferred_element_type=jnp.float32)
        + params["b1"], 0.0)
    h = jnp.maximum(
        jnp.dot(h.astype(jnp.bfloat16), params["w2"],
                preferred_element_type=jnp.float32) + params["b2"], 0.0)
    t = (jnp.dot(h.astype(jnp.bfloat16), params["w3"],
                 preferred_element_type=jnp.float32) + params["b3"])
    mu = t[:, :A]
    log_std = jnp.tanh(t[:, HD:HD + A])
    log_std = log_std_min + 0.5 * (log_std_max - log_std_min) * (log_std + 1.0)
    std = jnp.exp(log_std)
    pi = mu + noise * std
    log_pi = jnp.sum(-0.5 * noise * noise - log_std, axis=-1, keepdims=True)
    log_pi = log_pi - 0.5 * math.log(2.0 * math.pi) * A
    mu = jnp.tanh(mu)
    pi = jnp.tanh(pi)
    log_pi = log_pi - jnp.sum(
        jnp.log(jnp.maximum(1.0 - pi * pi, 0.0) + 1e-6), axis=-1, keepdims=True)
    return mu, pi, log_pi, log_std


if __name__ == "__main__":
    # Small shapes: identity encoder => feature_dim = obs_dim.
    batch = 2
    obs_dim = 32          # encoder_feature_dim (= obs_shape[0] for identity)
    action_dim = 4        # action_shape[0]
    hidden_dim = 32
    log_std_min, log_std_max = -10.0, 2.0

    key = jax.random.PRNGKey(0)
    k_obs, k_noise, k_params = jax.random.split(key, 3)

    obs = jax.random.normal(k_obs, (batch, obs_dim), jnp.float32)
    noise = jax.random.normal(k_noise, (batch, action_dim), jnp.float32)
    params = init_actor_params(k_params, obs_dim, action_dim, hidden_dim)

    mu, pi, log_pi, log_std = actor_forward(
        obs, noise, params, log_std_min=log_std_min, log_std_max=log_std_max)
    mu = jax.block_until_ready(mu)
    pi = jax.block_until_ready(pi)
    log_pi = jax.block_until_ready(log_pi)
    log_std = jax.block_until_ready(log_std)

    mu_r, pi_r, log_pi_r, log_std_r = _actor_forward_ref(
        obs, noise, params, log_std_min=log_std_min, log_std_max=log_std_max)

    assert mu.shape == (batch, action_dim)
    assert pi.shape == (batch, action_dim)
    assert log_pi.shape == (batch, 1)
    assert log_std.shape == (batch, action_dim)
    # bf16 matmul operands in both kernel and reference; tolerances allow for
    # accumulation-order / transcendental lowering differences.
    assert jnp.allclose(mu, mu_r, atol=2e-3, rtol=1e-3)
    assert jnp.allclose(pi, pi_r, atol=2e-3, rtol=1e-3)
    assert jnp.allclose(log_pi, log_pi_r, atol=5e-3, rtol=1e-3)
    assert jnp.allclose(log_std, log_std_r, atol=2e-3, rtol=1e-3)

    print("KERNEL_OK")
</pallas_src>

<mosaic_0001>
module attributes {stable_mosaic.version = 11 : i64} {
  func.func @_actor_kernel(%arg0: i32, %arg1: memref<16x32xf32, #tpu.memory_space<vmem>>, %arg2: memref<16x128xf32, #tpu.memory_space<vmem>>, %arg3: memref<32x32xbf16, #tpu.memory_space<vmem>>, %arg4: memref<1x32xf32, #tpu.memory_space<vmem>>, %arg5: memref<32x32xbf16, #tpu.memory_space<vmem>>, %arg6: memref<1x32xf32, #tpu.memory_space<vmem>>, %arg7: memref<32x256xbf16, #tpu.memory_space<vmem>>, %arg8: memref<1x256xf32, #tpu.memory_space<vmem>>, %arg9: memref<16x512xf32, #tpu.memory_space<vmem>>) attributes {dimension_semantics = [#tpu.dimension_semantics<parallel>], iteration_bounds = array<i64: 1>, scalar_prefetch = 0 : i64, scratch_operands = 0 : i64, tpu.core_type = #tpu.core_type<tc>, window_params = [{transform_indices = @transform_0, window_bounds = array<i64: 16, 32>}, {transform_indices = @transform_1, window_bounds = array<i64: 16, 128>}, {pipeline_mode = #tpu.pipeline_mode<synchronous>, transform_indices = @transform_2, window_bounds = array<i64: 32, 32>}, {pipeline_mode = #tpu.pipeline_mode<synchronous>, transform_indices = @transform_3, window_bounds = array<i64: 1, 32>}, {pipeline_mode = #tpu.pipeline_mode<synchronous>, transform_indices = @transform_4, window_bounds = array<i64: 32, 32>}, {pipeline_mode = #tpu.pipeline_mode<synchronous>, transform_indices = @transform_5, window_bounds = array<i64: 1, 32>}, {pipeline_mode = #tpu.pipeline_mode<synchronous>, transform_indices = @transform_6, window_bounds = array<i64: 32, 256>}, {pipeline_mode = #tpu.pipeline_mode<synchronous>, transform_indices = @transform_7, window_bounds = array<i64: 1, 256>}, {transform_indices = @transform_8, window_bounds = array<i64: 16, 512>}]} {
    %c0 = arith.constant 0 : index
    %c0_0 = arith.constant 0 : index
    %0 = vector.load %arg1[%c0, %c0_0] : memref<16x32xf32, #tpu.memory_space<vmem>>, vector<16x32xf32>
    %1 = arith.truncf %0 : vector<16x32xf32> to vector<16x32xbf16>
    %c0_1 = arith.constant 0 : index
    %c0_2 = arith.constant 0 : index
    %2 = vector.load %arg3[%c0_1, %c0_2] : memref<32x32xbf16, #tpu.memory_space<vmem>>, vector<32x32xbf16>
    %cst = arith.constant dense<0.000000e+00> : vector<16x32xf32>
    %3 = tpu.matmul %1, %2, %cst {dimension_numbers = #tpu.dot_dimension_numbers<[1], [0], [0], [1], [0, 0, 1, 1], [], []>} : vector<16x32xbf16>, vector<32x32xbf16>, vector<16x32xf32> -> vector<16x32xf32>
    %c0_3 = arith.constant 0 : index
    %c0_4 = arith.constant 0 : index
    %4 = vector.load %arg4[%c0_3, %c0_4] : memref<1x32xf32, #tpu.memory_space<vmem>>, vector<1x32xf32>
    %5 = vector.broadcast %4 : vector<1x32xf32> to vector<16x32xf32>
    %6 = arith.addf %3, %5 : vector<16x32xf32>
    %cst_5 = arith.constant 0.000000e+00 : f32
    %7 = vector.broadcast %cst_5 : f32 to vector<16x32xf32>
    %8 = arith.maximumf %6, %7 : vector<16x32xf32>
    %9 = arith.truncf %8 : vector<16x32xf32> to vector<16x32xbf16>
    %c0_6 = arith.constant 0 : index
    %c0_7 = arith.constant 0 : index
    %10 = vector.load %arg5[%c0_6, %c0_7] : memref<32x32xbf16, #tpu.memory_space<vmem>>, vector<32x32xbf16>
    %cst_8 = arith.constant dense<0.000000e+00> : vector<16x32xf32>
    %11 = tpu.matmul %9, %10, %cst_8 {dimension_numbers = #tpu.dot_dimension_numbers<[1], [0], [0], [1], [0, 0, 1, 1], [], []>} : vector<16x32xbf16>, vector<32x32xbf16>, vector<16x32xf32> -> vector<16x32xf32>
    %c0_9 = arith.constant 0 : index
    %c0_10 = arith.constant 0 : index
    %12 = vector.load %arg6[%c0_9, %c0_10] : memref<1x32xf32, #tpu.memory_space<vmem>>, vector<1x32xf32>
    %13 = vector.broadcast %12 : vector<1x32xf32> to vector<16x32xf32>
    %14 = arith.addf %11, %13 : vector<16x32xf32>
    %cst_11 = arith.constant 0.000000e+00 : f32
    %15 = vector.broadcast %cst_11 : f32 to vector<16x32xf32>
    %16 = arith.maximumf %14, %15 : vector<16x32xf32>
    %17 = arith.truncf %16 : vector<16x32xf32> to vector<16x32xbf16>
    %c0_12 = arith.constant 0 : index
    %c0_13 = arith.constant 0 : index
    %18 = vector.load %arg7[%c0_12, %c0_13] : memref<32x256xbf16, #tpu.memory_space<vmem>>, vector<32x256xbf16>
    %cst_14 = arith.constant dense<0.000000e+00> : vector<16x256xf32>
    %19 = tpu.matmul %17, %18, %cst_14 {dimension_numbers = #tpu.dot_dimension_numbers<[1], [0], [0], [1], [0, 0, 1, 1], [], []>} : vector<16x32xbf16>, vector<32x256xbf16>, vector<16x256xf32> -> vector<16x256xf32>
    %c0_15 = arith.constant 0 : index
    %c0_16 = arith.constant 0 : index
    %20 = vector.load %arg8[%c0_15, %c0_16] : memref<1x256xf32, #tpu.memory_space<vmem>>, vector<1x256xf32>
    %21 = vector.broadcast %20 : vector<1x256xf32> to vector<16x256xf32>
    %22 = arith.addf %19, %21 : vector<16x256xf32>
    %23 = vector.extract_strided_slice %22 {offsets = [0, 0], sizes = [16, 128], strides = [1, 1]} : vector<16x256xf32> to vector<16x128xf32>
    %24 = vector.extract_strided_slice %22 {offsets = [0, 128], sizes = [16, 128], strides = [1, 1]} : vector<16x256xf32> to vector<16x128xf32>
    %25 = math.tanh %24 : vector<16x128xf32>
    %cst_17 = arith.constant 1.000000e+00 : f32
    %26 = vector.broadcast %cst_17 : f32 to vector<16x128xf32>
    %27 = arith.addf %25, %26 : vector<16x128xf32>
    %cst_18 = arith.constant 6.000000e+00 : f32
    %28 = vector.broadcast %cst_18 : f32 to vector<16x128xf32>
    %29 = arith.mulf %28, %27 : vector<16x128xf32>
    %cst_19 = arith.constant -1.000000e+01 : f32
    %30 = vector.broadcast %cst_19 : f32 to vector<16x128xf32>
    %31 = arith.addf %30, %29 : vector<16x128xf32>
    %c0_20 = arith.constant 0 : index
    %c0_21 = arith.constant 0 : index
    %32 = vector.load %arg2[%c0_20, %c0_21] : memref<16x128xf32, #tpu.memory_space<vmem>>, vector<16x128xf32>
    %33 = math.exp %31 : vector<16x128xf32>
    %34 = arith.mulf %32, %33 : vector<16x128xf32>
    %35 = arith.addf %23, %34 : vector<16x128xf32>
    %36 = tpu.iota {dimensions = array<i32: 1>} : vector<16x128xi32>
    %c4_i32 = arith.constant 4 : i32
    %37 = vector.broadcast %c4_i32 : i32 to vector<16x128xi32>
    %38 = arith.cmpi slt, %36, %37 : vector<16x128xi32>
    %cst_22 = arith.constant -5.000000e-01 : f32
    %39 = vector.broadcast %cst_22 : f32 to vector<16x128xf32>
    %40 = arith.mulf %39, %32 : vector<16x128xf32>
    %41 = arith.mulf %40, %32 : vector<16x128xf32>
    %42 = arith.subf %41, %31 : vector<16x128xf32>
    %cst_23 = arith.constant 0.000000e+00 : f32
    %43 = vector.broadcast %cst_23 : f32 to vector<16x128xf32>
    %44 = arith.select %38, %42, %43 : vector<16x128xi1>, vector<16x128xf32>
    %cst_24 = arith.constant dense<0.000000e+00> : vector<16xf32>
    %45 = vector.multi_reduction <add>, %44, %cst_24 [1] : vector<16x128xf32> to vector<16xf32>
    %46 = vector.shape_cast %45 : vector<16xf32> to vector<16x1xf32>
    %cst_25 = arith.constant 3.67575407 : f32
    %47 = vector.broadcast %cst_25 : f32 to vector<16x1xf32>
    %48 = arith.subf %46, %47 : vector<16x1xf32>
    %49 = math.tanh %23 : vector<16x128xf32>
    %50 = math.tanh %35 : vector<16x128xf32>
    %51 = arith.mulf %50, %50 : vector<16x128xf32>
    %cst_26 = arith.constant 1.000000e+00 : f32
    %52 = vector.broadcast %cst_26 : f32 to vector<16x128xf32>
    %53 = arith.subf %52, %51 : vector<16x128xf32>
    %cst_27 = arith.constant 0.000000e+00 : f32
    %54 = vector.broadcast %cst_27 : f32 to vector<16x128xf32>
    %55 = arith.maximumf %53, %54 : vector<16x128xf32>
    %cst_28 = arith.constant 9.99999997E-7 : f32
    %56 = vector.broadcast %cst_28 : f32 to vector<16x128xf32>
    %57 = arith.addf %55, %56 : vector<16x128xf32>
    %58 = math.log %57 : vector<16x128xf32>
    %cst_29 = arith.constant 0.000000e+00 : f32
    %59 = vector.broadcast %cst_29 : f32 to vector<16x128xf32>
    %60 = arith.select %38, %58, %59 : vector<16x128xi1>, vector<16x128xf32>
    %cst_30 = arith.constant dense<0.000000e+00> : vector<16xf32>
    %61 = vector.multi_reduction <add>, %60, %cst_30 [1] : vector<16x128xf32> to vector<16xf32>
    %62 = vector.shape_cast %61 : vector<16xf32> to vector<16x1xf32>
    %63 = arith.subf %48, %62 : vector<16x1xf32>
    %c0_31 = arith.constant 0 : index
    %c0_32 = arith.constant 0 : index
    %64 = vector.load %arg9[%c0_31, %c0_32] : memref<16x512xf32, #tpu.memory_space<vmem>>, vector<16x128xf32>
    tpu.vector_store %arg9[%c0_31, %c0_32], %49 {strides = array<i32>} : memref<16x512xf32, #tpu.memory_space<vmem>>, vector<16x128xf32>,
    %c0_33 = arith.constant 0 : index
    %c128 = arith.constant 128 : index
    %65 = vector.load %arg9[%c0_33, %c128] : memref<16x512xf32, #tpu.memory_space<vmem>>, vector<16x128xf32>
    tpu.vector_store %arg9[%c0_33, %c128], %50 {strides = array<i32>} : memref<16x512xf32, #tpu.memory_space<vmem>>, vector<16x128xf32>,
    %c0_34 = arith.constant 0 : index
    %c256 = arith.constant 256 : index
    %66 = vector.load %arg9[%c0_34, %c256] : memref<16x512xf32, #tpu.memory_space<vmem>>, vector<16x128xf32>
    tpu.vector_store %arg9[%c0_34, %c256], %31 {strides = array<i32>} : memref<16x512xf32, #tpu.memory_space<vmem>>, vector<16x128xf32>,
    %67 = vector.shape_cast %63 : vector<16x1xf32> to vector<16x1xf32>
    %68 = vector.broadcast %67 : vector<16x1xf32> to vector<16x128xf32>
    %c0_35 = arith.constant 0 : index
    %c384 = arith.constant 384 : index
    %69 = vector.load %arg9[%c0_35, %c384] : memref<16x512xf32, #tpu.memory_space<vmem>>, vector<16x128xf32>
    tpu.vector_store %arg9[%c0_35, %c384], %68 {strides = array<i32>} : memref<16x512xf32, #tpu.memory_space<vmem>>, vector<16x128xf32>,
    return
  }
  func.func @transform_0(%arg0: i32) -> (i32, i32) {
    %c0_i32 = arith.constant 0 : i32
    %c0_i32_0 = arith.constant 0 : i32
    return %arg0, %c0_i32 : i32, i32
  }
  func.func @transform_1(%arg0: i32) -> (i32, i32) {
    %c0_i32 = arith.constant 0 : i32
    %c0_i32_0 = arith.constant 0 : i32
    return %arg0, %c0_i32 : i32, i32
  }
  func.func @transform_2(%arg0: i32) -> (i32, i32) {
    %c0_i32 = arith.constant 0 : i32
    %c0_i32_0 = arith.constant 0 : i32
    %c0_i32_1 = arith.constant 0 : i32
    return %c0_i32, %c0_i32_0 : i32, i32
  }
  func.func @transform_3(%arg0: i32) -> (i32, i32) {
    %c0_i32 = arith.constant 0 : i32
    %c0_i32_0 = arith.constant 0 : i32
    %c0_i32_1 = arith.constant 0 : i32
    return %c0_i32, %c0_i32_0 : i32, i32
  }
  func.func @transform_4(%arg0: i32) -> (i32, i32) {
    %c0_i32 = arith.constant 0 : i32
    %c0_i32_0 = arith.constant 0 : i32
    %c0_i32_1 = arith.constant 0 : i32
    return %c0_i32, %c0_i32_0 : i32, i32
  }
  func.func @transform_5(%arg0: i32) -> (i32, i32) {
    %c0_i32 = arith.constant 0 : i32
    %c0_i32_0 = arith.constant 0 : i32
    %c0_i32_1 = arith.constant 0 : i32
    return %c0_i32, %c0_i32_0 : i32, i32
  }
  func.func @transform_6(%arg0: i32) -> (i32, i32) {
    %c0_i32 = arith.constant 0 : i32
    %c0_i32_0 = arith.constant 0 : i32
    %c0_i32_1 = arith.constant 0 : i32
    return %c0_i32, %c0_i32_0 : i32, i32
  }
  func.func @transform_7(%arg0: i32) -> (i32, i32) {
    %c0_i32 = arith.constant 0 : i32
    %c0_i32_0 = arith.constant 0 : i32
    %c0_i32_1 = arith.constant 0 : i32
    return %c0_i32, %c0_i32_0 : i32, i32
  }
  func.func @transform_8(%arg0: i32) -> (i32, i32) {
    %c0_i32 = arith.constant 0 : i32
    %c0_i32_0 = arith.constant 0 : i32
    return %arg0, %c0_i32 : i32, i32
  }
}

module attributes {stable_mosaic.version = 11 : i64} {
  func.func @_actor_kernel(%arg0: i32, %arg1: memref<16x32xf32, #tpu.memory_space<vmem>>, %arg2: memref<16x128xf32, #tpu.memory_space<vmem>>, %arg3: memref<32x32xbf16, #tpu.memory_space<vmem>>, %arg4: memref<1x32xf32, #tpu.memory_space<vmem>>, %arg5: memref<32x32xbf16, #tpu.memory_space<vmem>>, %arg6: memref<1x32xf32, #tpu.memory_space<vmem>>, %arg7: memref<32x256xbf16, #tpu.memory_space<vmem>>, %arg8: memref<1x256xf32, #tpu.memory_space<vmem>>, %arg9: memref<16x512xf32, #tpu.memory_space<vmem>>) attributes {dimension_semantics = [#tpu.dimension_semantics<parallel>], iteration_bounds = array<i64: 1>, scalar_prefetch = 0 : i64, scratch_operands = 0 : i64, tpu.core_type = #tpu.core_type<tc>, window_params = [{transform_indices = @transform_0, window_bounds = array<i64: 16, 32>}, {transform_indices = @transform_1, window_bounds = array<i64: 16, 128>}, {pipeline_mode = #tpu.pipeline_mode<synchronous>, transform_indices = @transform_2, window_bounds = array<i64: 32, 32>}, {pipeline_mode = #tpu.pipeline_mode<synchronous>, transform_indices = @transform_3, window_bounds = array<i64: 1, 32>}, {pipeline_mode = #tpu.pipeline_mode<synchronous>, transform_indices = @transform_4, window_bounds = array<i64: 32, 32>}, {pipeline_mode = #tpu.pipeline_mode<synchronous>, transform_indices = @transform_5, window_bounds = array<i64: 1, 32>}, {pipeline_mode = #tpu.pipeline_mode<synchronous>, transform_indices = @transform_6, window_bounds = array<i64: 32, 256>}, {pipeline_mode = #tpu.pipeline_mode<synchronous>, transform_indices = @transform_7, window_bounds = array<i64: 1, 256>}, {transform_indices = @transform_8, window_bounds = array<i64: 16, 512>}]} {
    %c0 = arith.constant 0 : index
    %c0_0 = arith.constant 0 : index
    %0 = vector.load %arg1[%c0, %c0_0] : memref<16x32xf32, #tpu.memory_space<vmem>>, vector<16x32xf32>
    %1 = arith.truncf %0 : vector<16x32xf32> to vector<16x32xbf16>
    %c0_1 = arith.constant 0 : index
    %c0_2 = arith.constant 0 : index
    %2 = vector.load %arg3[%c0_1, %c0_2] : memref<32x32xbf16, #tpu.memory_space<vmem>>, vector<32x32xbf16>
    %cst = arith.constant dense<0.000000e+00> : vector<16x32xf32>
    %3 = tpu.matmul %1, %2, %cst {dimension_numbers = #tpu.dot_dimension_numbers<[1], [0], [0], [1], [0, 0, 1, 1], [], []>} : vector<16x32xbf16>, vector<32x32xbf16>, vector<16x32xf32> -> vector<16x32xf32>
    %c0_3 = arith.constant 0 : index
    %c0_4 = arith.constant 0 : index
    %4 = vector.load %arg4[%c0_3, %c0_4] : memref<1x32xf32, #tpu.memory_space<vmem>>, vector<1x32xf32>
    %5 = vector.broadcast %4 : vector<1x32xf32> to vector<16x32xf32>
    %6 = arith.addf %3, %5 : vector<16x32xf32>
    %cst_5 = arith.constant 0.000000e+00 : f32
    %7 = vector.broadcast %cst_5 : f32 to vector<16x32xf32>
    %8 = arith.maximumf %6, %7 : vector<16x32xf32>
    %9 = arith.truncf %8 : vector<16x32xf32> to vector<16x32xbf16>
    %c0_6 = arith.constant 0 : index
    %c0_7 = arith.constant 0 : index
    %10 = vector.load %arg5[%c0_6, %c0_7] : memref<32x32xbf16, #tpu.memory_space<vmem>>, vector<32x32xbf16>
    %cst_8 = arith.constant dense<0.000000e+00> : vector<16x32xf32>
    %11 = tpu.matmul %9, %10, %cst_8 {dimension_numbers = #tpu.dot_dimension_numbers<[1], [0], [0], [1], [0, 0, 1, 1], [], []>} : vector<16x32xbf16>, vector<32x32xbf16>, vector<16x32xf32> -> vector<16x32xf32>
    %c0_9 = arith.constant 0 : index
    %c0_10 = arith.constant 0 : index
    %12 = vector.load %arg6[%c0_9, %c0_10] : memref<1x32xf32, #tpu.memory_space<vmem>>, vector<1x32xf32>
    %13 = vector.broadcast %12 : vector<1x32xf32> to vector<16x32xf32>
    %14 = arith.addf %11, %13 : vector<16x32xf32>
    %cst_11 = arith.constant 0.000000e+00 : f32
    %15 = vector.broadcast %cst_11 : f32 to vector<16x32xf32>
    %16 = arith.maximumf %14, %15 : vector<16x32xf32>
    %17 = arith.truncf %16 : vector<16x32xf32> to vector<16x32xbf16>
    %c0_12 = arith.constant 0 : index
    %c0_13 = arith.constant 0 : index
    %18 = vector.load %arg7[%c0_12, %c0_13] : memref<32x256xbf16, #tpu.memory_space<vmem>>, vector<32x256xbf16>
    %cst_14 = arith.constant dense<0.000000e+00> : vector<16x256xf32>
    %19 = tpu.matmul %17, %18, %cst_14 {dimension_numbers = #tpu.dot_dimension_numbers<[1], [0], [0], [1], [0, 0, 1, 1], [], []>} : vector<16x32xbf16>, vector<32x256xbf16>, vector<16x256xf32> -> vector<16x256xf32>
    %c0_15 = arith.constant 0 : index
    %c0_16 = arith.constant 0 : index
    %20 = vector.load %arg8[%c0_15, %c0_16] : memref<1x256xf32, #tpu.memory_space<vmem>>, vector<1x256xf32>
    %21 = vector.broadcast %20 : vector<1x256xf32> to vector<16x256xf32>
    %22 = arith.addf %19, %21 : vector<16x256xf32>
    %23 = vector.extract_strided_slice %22 {offsets = [0, 0], sizes = [16, 128], strides = [1, 1]} : vector<16x256xf32> to vector<16x128xf32>
    %24 = vector.extract_strided_slice %22 {offsets = [0, 128], sizes = [16, 128], strides = [1, 1]} : vector<16x256xf32> to vector<16x128xf32>
    %25 = math.tanh %24 : vector<16x128xf32>
    %cst_17 = arith.constant 1.000000e+00 : f32
    %26 = vector.broadcast %cst_17 : f32 to vector<16x128xf32>
    %27 = arith.addf %25, %26 : vector<16x128xf32>
    %cst_18 = arith.constant 6.000000e+00 : f32
    %28 = vector.broadcast %cst_18 : f32 to vector<16x128xf32>
    %29 = arith.mulf %28, %27 : vector<16x128xf32>
    %cst_19 = arith.constant -1.000000e+01 : f32
    %30 = vector.broadcast %cst_19 : f32 to vector<16x128xf32>
    %31 = arith.addf %30, %29 : vector<16x128xf32>
    %c0_20 = arith.constant 0 : index
    %c0_21 = arith.constant 0 : index
    %32 = vector.load %arg2[%c0_20, %c0_21] : memref<16x128xf32, #tpu.memory_space<vmem>>, vector<16x128xf32>
    %33 = math.exp %31 : vector<16x128xf32>
    %34 = arith.mulf %32, %33 : vector<16x128xf32>
    %35 = arith.addf %23, %34 : vector<16x128xf32>
    %36 = tpu.iota {dimensions = array<i32: 1>} : vector<16x128xi32>
    %c4_i32 = arith.constant 4 : i32
    %37 = vector.broadcast %c4_i32 : i32 to vector<16x128xi32>
    %38 = arith.cmpi slt, %36, %37 : vector<16x128xi32>
    %cst_22 = arith.constant -5.000000e-01 : f32
    %39 = vector.broadcast %cst_22 : f32 to vector<16x128xf32>
    %40 = arith.mulf %39, %32 : vector<16x128xf32>
    %41 = arith.mulf %40, %32 : vector<16x128xf32>
    %42 = arith.subf %41, %31 : vector<16x128xf32>
    %cst_23 = arith.constant 0.000000e+00 : f32
    %43 = vector.broadcast %cst_23 : f32 to vector<16x128xf32>
    %44 = arith.select %38, %42, %43 : vector<16x128xi1>, vector<16x128xf32>
    %cst_24 = arith.constant dense<0.000000e+00> : vector<16xf32>
    %45 = vector.multi_reduction <add>, %44, %cst_24 [1] : vector<16x128xf32> to vector<16xf32>
    %46 = vector.shape_cast %45 : vector<16xf32> to vector<16x1xf32>
    %cst_25 = arith.constant 3.67575407 : f32
    %47 = vector.broadcast %cst_25 : f32 to vector<16x1xf32>
    %48 = arith.subf %46, %47 : vector<16x1xf32>
    %49 = math.tanh %23 : vector<16x128xf32>
    %50 = math.tanh %35 : vector<16x128xf32>
    %51 = arith.mulf %50, %50 : vector<16x128xf32>
    %cst_26 = arith.constant 1.000000e+00 : f32
    %52 = vector.broadcast %cst_26 : f32 to vector<16x128xf32>
    %53 = arith.subf %52, %51 : vector<16x128xf32>
    %cst_27 = arith.constant 0.000000e+00 : f32
    %54 = vector.broadcast %cst_27 : f32 to vector<16x128xf32>
    %55 = arith.maximumf %53, %54 : vector<16x128xf32>
    %cst_28 = arith.constant 9.99999997E-7 : f32
    %56 = vector.broadcast %cst_28 : f32 to vector<16x128xf32>
    %57 = arith.addf %55, %56 : vector<16x128xf32>
    %58 = math.log %57 : vector<16x128xf32>
    %cst_29 = arith.constant 0.000000e+00 : f32
    %59 = vector.broadcast %cst_29 : f32 to vector<16x128xf32>
    %60 = arith.select %38, %58, %59 : vector<16x128xi1>, vector<16x128xf32>
    %cst_30 = arith.constant dense<0.000000e+00> : vector<16xf32>
    %61 = vector.multi_reduction <add>, %60, %cst_30 [1] : vector<16x128xf32> to vector<16xf32>
    %62 = vector.shape_cast %61 : vector<16xf32> to vector<16x1xf32>
    %63 = arith.subf %48, %62 : vector<16x1xf32>
    %c0_31 = arith.constant 0 : index
    %c0_32 = arith.constant 0 : index
    %64 = vector.load %arg9[%c0_31, %c0_32] : memref<16x512xf32, #tpu.memory_space<vmem>>, vector<16x128xf32>
    tpu.vector_store %arg9[%c0_31, %c0_32], %49 {strides = array<i32>} : memref<16x512xf32, #tpu.memory_space<vmem>>, vector<16x128xf32>,
    %c0_33 = arith.constant 0 : index
    %c128 = arith.constant 128 : index
    %65 = vector.load %arg9[%c0_33, %c128] : memref<16x512xf32, #tpu.memory_space<vmem>>, vector<16x128xf32>
    tpu.vector_store %arg9[%c0_33, %c128], %50 {strides = array<i32>} : memref<16x512xf32, #tpu.memory_space<vmem>>, vector<16x128xf32>,
    %c0_34 = arith.constant 0 : index
    %c256 = arith.constant 256 : index
    %66 = vector.load %arg9[%c0_34, %c256] : memref<16x512xf32, #tpu.memory_space<vmem>>, vector<16x128xf32>
    tpu.vector_store %arg9[%c0_34, %c256], %31 {strides = array<i32>} : memref<16x512xf32, #tpu.memory_space<vmem>>, vector<16x128xf32>,
    %67 = vector.shape_cast %63 : vector<16x1xf32> to vector<16x1xf32>
    %68 = vector.broadcast %67 : vector<16x1xf32> to vector<16x128xf32>
    %c0_35 = arith.constant 0 : index
    %c384 = arith.constant 384 : index
    %69 = vector.load %arg9[%c0_35, %c384] : memref<16x512xf32, #tpu.memory_space<vmem>>, vector<16x128xf32>
    tpu.vector_store %arg9[%c0_35, %c384], %68 {strides = array<i32>} : memref<16x512xf32, #tpu.memory_space<vmem>>, vector<16x128xf32>,
    return
  }
  func.func @transform_0(%arg0: i32) -> (i32, i32) {
    %c0_i32 = arith.constant 0 : i32
    %c0_i32_0 = arith.constant 0 : i32
    return %arg0, %c0_i32 : i32, i32
  }
  func.func @transform_1(%arg0: i32) -> (i32, i32) {
    %c0_i32 = arith.constant 0 : i32
    %c0_i32_0 = arith.constant 0 : i32
    return %arg0, %c0_i32 : i32, i32
  }
  func.func @transform_2(%arg0: i32) -> (i32, i32) {
    %c0_i32 = arith.constant 0 : i32
    %c0_i32_0 = arith.constant 0 : i32
    %c0_i32_1 = arith.constant 0 : i32
    return %c0_i32, %c0_i32_0 : i32, i32
  }
  func.func @transform_3(%arg0: i32) -> (i32, i32) {
    %c0_i32 = arith.constant 0 : i32
    %c0_i32_0 = arith.constant 0 : i32
    %c0_i32_1 = arith.constant 0 : i32
    return %c0_i32, %c0_i32_0 : i32, i32
  }
  func.func @transform_4(%arg0: i32) -> (i32, i32) {
    %c0_i32 = arith.constant 0 : i32
    %c0_i32_0 = arith.constant 0 : i32
    %c0_i32_1 = arith.constant 0 : i32
    return %c0_i32, %c0_i32_0 : i32, i32
  }
  func.func @transform_5(%arg0: i32) -> (i32, i32) {
    %c0_i32 = arith.constant 0 : i32
    %c0_i32_0 = arith.constant 0 : i32
    %c0_i32_1 = arith.constant 0 : i32
    return %c0_i32, %c0_i32_0 : i32, i32
  }
  func.func @transform_6(%arg0: i32) -> (i32, i32) {
    %c0_i32 = arith.constant 0 : i32
    %c0_i32_0 = arith.constant 0 : i32
    %c0_i32_1 = arith.constant 0 : i32
    return %c0_i32, %c0_i32_0 : i32, i32
  }
  func.func @transform_7(%arg0: i32) -> (i32, i32) {
    %c0_i32 = arith.constant 0 : i32
    %c0_i32_0 = arith.constant 0 : i32
    %c0_i32_1 = arith.constant 0 : i32
    return %c0_i32, %c0_i32_0 : i32, i32
  }
  func.func @transform_8(%arg0: i32) -> (i32, i32) {
    %c0_i32 = arith.constant 0 : i32
    %c0_i32_0 = arith.constant 0 : i32
    return %arg0, %c0_i32 : i32, i32
  }
}

</mosaic_0001>

<bundles_post_ra>
// kernel: tpu_custom_call.1
= control target key start
LH: loop header
LB: loop body
LE: loop exit
PB: predicated region body
PF: predicated region fallthrough
CT: control target
= control target key end

     0   :  { %13 = vsyncpa [#allocation3], 0  ;;  %s1049_s0 = inlined_call_operand.hbm [shape: f32[2,32], index: 0, kind: input, shape index: {}]   ;;  %s1050_s1 = inlined_call_operand.vmem [shape: f32[2,128], index: 1, kind: input, shape index: {}]   ;;  %s1051_s2 = inlined_call_operand.hbm [shape: bf16[32,32], index: 2, kind: input, shape index: {}]   ;;  %s1052_s3 = inlined_call_operand.vmem [shape: f32[1,32], index: 3, kind: input, shape index: {}]   ;;  %s1053_s4 = inlined_call_operand.hbm [shape: bf16[32,32], index: 4, kind: input, shape index: {}]   ;;  %s1054_s5 = inlined_call_operand.vmem [shape: f32[1,32], index: 5, kind: input, shape index: {}]   ;;  %s1055_s6 = inlined_call_operand.hbm [shape: bf16[32,256], index: 6, kind: input, shape index: {}]   ;;  %s1056_s7 = inlined_call_operand.vmem [shape: f32[1,256], index: 7, kind: input, shape index: {}]   ;;  %s1057_s8 = inlined_call_operand.hbm [shape: f32[2,512], index: 8, kind: output, shape index: {}]  }
   0x1   :  { %14 = vsyncpa [#allocation6], 0 }
   0x2   :  { %15 = vsyncpa [#allocation9], 0 }
   0x3   :  { %16 = vsyncpa [#allocation4], 0 }
   0x4   :  { %21 = vsyncadd [#allocation3], 224  ;;  %s836_s27 = smov [#allocation5]   ;;  %s718_s9 = scalar_lea.hbm %s1051_s2, 256 }
   0x5   :  { %s36_s28 = sshll.u32 %s836_s27, 4  ;;  %p719_p0 = scmp.ne.s32.totalorder %s1051_s2, %s718_s9  ;;  %s37_s28 = int_to_ptr.vmem [resolvable:$true] %s36_s28 }
   0x6   :  { %p722_p1 = scmp.lt.u32.totalorder %s718_s9, %s1051_s2 }
   0x8   :  { %p724_p2 = pnand %p722_p1, %p719_p0 }
   0xa   :  { %727 = shalt.err (!%p724_p2)
}
   0xb   :  { %s728_s14 = scalar_lea.vmem %s37_s28, 256  ;;  %p733_p4 = scmp.lt.s32.totalorder %s37_s28, %s37_s28 }
   0xc   :  { %p729_p3 = scmp.ne.s32.totalorder %s37_s28, %s728_s14  ;;  %p734_p5 = scmp.lt.s32.totalorder %s728_s14, %s728_s14 }
   0xe   :  { %p735_p6 = por %p734_p5, %p733_p4 }
  0x10   :  { %p736_p7 = pnand %p735_p6, %p729_p3 }
  0x12   :  { %739 = shalt.err (!%p736_p7)
}
  0x13   :  { %s837_s15 = smov 64   ;;  %s838_s16 = smov 4  }
  0x14   :  { %42 = dma.hbm_to_vmem [thread:$0]  %s1051_s2, 256, %s37_s28, [#allocation6], %s837_s15, %s837_s15, %s838_s16  }
  0x15   :  { %s839_s19 = smov [#allocation2]   ;;  %s740_s23 = scalar_lea.hbm %s1049_s0, 32 }
  0x16   :  { %s22_s20 = sshll.u32 %s839_s19, 4  ;;  %p741_p8 = scmp.ne.s32.totalorder %s1049_s0, %s740_s23  ;;  %s23_s20 = int_to_ptr.vmem [resolvable:$true] %s22_s20 }
  0x17   :  { %p744_p9 = scmp.lt.u32.totalorder %s740_s23, %s1049_s0 }
  0x19   :  { %p746_p10 = pnand %p744_p9, %p741_p8 }
  0x1b   :  { %749 = shalt.err (!%p746_p10)
}
  0x1c   :  { %s750_s29 = scalar_lea.vmem %s23_s20, 32  ;;  %s754_s2 = scalar_lea.vmem %s23_s20, 256 }
  0x1d   :  { %p751_p11 = scmp.ne.s32.totalorder %s23_s20, %s750_s29  ;;  %p755_p12 = scmp.lt.s32.totalorder %s23_s20, %s23_s20 }
  0x1e   :  { %p756_p13 = scmp.lt.s32.totalorder %s754_s2, %s750_s29 }
  0x20   :  { %p757_p0 = por %p756_p13, %p755_p12 }
  0x22   :  { %p758_p1 = pnand %p757_p0, %p751_p11 }
  0x24   :  { %761 = shalt.err (!%p758_p1)
}
  0x25   :  { %s840_s28 = smov 32   ;;  %s841_s30 = smov 2  }
  0x26   :  { %28 = dma.hbm_to_vmem [thread:$0]  %s1049_s0, 32, %s23_s20, [#allocation3], %s840_s28, %s840_s28, %s841_s30  }
  0x27   :  { %s842_s11 = smov [#allocation7]   ;;  %s843_s13 = smov [#allocation8]  }
  0x28   :  { %s50_s12 = sshll.u32 %s842_s11, 4  ;;  %s64_s14 = sshll.u32 %s843_s13, 4  ;;  %s51_s12 = int_to_ptr.vmem [resolvable:$true] %s50_s12  ;;  %s927_s14 = int_to_ptr.vmem [resolvable:$true] %s64_s14 }
  0x29   :  { %s762_s19 = scalar_lea.hbm %s1053_s4, 256 }
  0x2a   :  { %p763_p2 = scmp.ne.s32.totalorder %s1053_s4, %s762_s19  ;;  %p766_p3 = scmp.lt.u32.totalorder %s762_s19, %s1053_s4 }
  0x2c   :  { %p768_p4 = pnand %p766_p3, %p763_p2 }
  0x2e   :  { %771 = shalt.err (!%p768_p4)
}
  0x2f   :  { %s772_s0 = scalar_lea.vmem %s51_s12, 256  ;;  %p777_p6 = scmp.lt.s32.totalorder %s51_s12, %s51_s12 }
  0x30   :  { %p773_p5 = scmp.ne.s32.totalorder %s51_s12, %s772_s0  ;;  %p778_p7 = scmp.lt.s32.totalorder %s772_s0, %s772_s0 }
  0x32   :  { %p779_p8 = por %p778_p7, %p777_p6 }
  0x34   :  { %p780_p9 = pnand %p779_p8, %p773_p5 }
  0x36   :  { %783 = shalt.err (!%p780_p9)
}
  0x37   :  { %56 = dma.hbm_to_vmem [thread:$0]  %s1053_s4, 256, %s51_s12, [#allocation6], %s837_s15, %s837_s15, %s838_s16  }
  0x38   :  { %s784_s29 = scalar_lea.hbm %s1055_s6, 512 }
  0x39   :  { %p785_p10 = scmp.ne.s32.totalorder %s1055_s6, %s784_s29  ;;  %p788_p11 = scmp.lt.u32.totalorder %s784_s29, %s1055_s6 }
  0x3b   :  { %p790_p12 = pnand %p788_p11, %p785_p10 }
  0x3d   :  { %793 = shalt.err (!%p790_p12)
}
  0x3e   :  { %s794_s10 = scalar_lea.vmem %s927_s14, 512  ;;  %p799_p0 = scmp.lt.s32.totalorder %s927_s14, %s927_s14 }
  0x3f   :  { %p795_p13 = scmp.ne.s32.totalorder %s927_s14, %s794_s10  ;;  %p800_p1 = scmp.lt.s32.totalorder %s794_s10, %s794_s10 }
  0x41   :  { %p801_p2 = por %p800_p1, %p799_p0 }
  0x43   :  { %p802_p3 = pnand %p801_p2, %p795_p13 }
  0x45   :  { %805 = shalt.err (!%p802_p3)
}
  0x46   :  { %s844_s4 = smov 128   ;;  %s845_s15 = smov 8  }
  0x47   :  { %70 = dma.hbm_to_vmem [thread:$0]  %s1055_s6, 512, %s927_s14, [#allocation9], %s844_s4, %s844_s4, %s845_s15  }
  0x48   :  { %828 = dma.done.wait [#allocation3], 256  }
  0x49   :  { %829 = vsyncadd [#allocation3], 4294967040 }
  0x4a   :  { %830 = dma.done.wait [#allocation6], 512  }
  0x4b   :  { %831 = vsyncadd [#allocation6], 4294966784 }
  0x4c   :  { %832 = dma.done.wait [#allocation9], 512  }
  0x4d   :  { %833 = vsyncadd [#allocation9], 4294966784  ;;  %v846_v0 = vmov 0.0   ;;  %vm847_vm0 = vmmov 0   ;;  %v688_v1 = vld [vmem:[#allocation5] sm:$0xff]   ;;  %v689_v2 = vld [vmem:[#allocation5 + $0x8] sm:$0xff]   ;;  %v236_v33 = vlaneseq }
  0x4e   :  { %653 = vmatprep.subr.bf16.mxu0 %v846_v0  ;;  %657 = vmatprep.mubr.msk.bf16.mxu0 %vm847_vm0, %v846_v0  ;;  %v86_v3 = vld [vmem:[#allocation2] sm:$0xff]  ;;  %v87_v4 = vld [vmem:[#allocation2 + $0x8] sm:$0xff]  ;;  %vm112_vm1 = vcmask 261120   ;;  %v694_v18 = vld [vmem:[#allocation8 + $0x4] ss:$8 sps:$4 sm:$0xff]   ;;  %v848_v22 = vmov 0  }
  0x4f   :  { %661 = vmatprep.subr.bf16.mxu1 %v846_v0  ;;  %665 = vmatprep.mubr.msk.bf16.mxu1 %vm847_vm0, %v846_v0  ;;  %v88_v5 = vpack.c.bf16 %v87_v4, %v86_v3  ;;  %v690_v6 = vld [vmem:[#allocation7] sm:$0xff]   ;;  %v691_v7 = vld [vmem:[#allocation7 + $0x8] sm:$0xff]   ;;  %v692_v19 = vld [vmem:[#allocation8] ss:$8 sps:$4 sm:$0xff]   ;;  %v973_v34 = vshrl.u32 %v236_v33, 7  ;;  %v1001_v61 = vand.u32 127, %v236_v33 }
  0x50   :  { %654 = vmatpush3.bf16.msra.mxu0 %v688_v1  ;;  %662 = vmatpush3.bf16.msra.mxu1 %v690_v6  ;;  %v620_v8 = vld [vmem:[%s1052_s3] ss:$0 sm:$0xff]  ;;  %v697_v20 = vld [vmem:[#allocation8 + $0x14] ss:$8 sps:$4 sm:$0xff]   ;;  %v849_v43 = vmov 1983009808  }
  0x51   :  { %655 = vmatprep.subr.bf16.mxu0 %v846_v0  ;;  %663 = vmatprep.subr.bf16.mxu1 %v846_v0  ;;  %v695_v21 = vld [vmem:[#allocation8 + $0x10] ss:$8 sps:$4 sm:$0xff]   ;;  %v238_v35 = vsub.s32 0, %v973_v34  ;;  %v242_v37 = vsub.s32 1, %v973_v34  ;;  %v375_v44 = vunpack.c.l.s4 %v849_v43  ;;  %vm332_vm2 = vcmp.lt.s32.totalorder %v1001_v61, 4 }
  0x52   :  { %v624_v23 = vld [vmem:[%s1054_s5] ss:$0 sm:$0xff]  ;;  %v997_v53 = vld [vmem:[%s1050_s1 + $0x8] sm:$0xff] }
  0x53   :  { %v234_v36 = vld [vmem:[%s1056_s7] sm:$0x3]  ;;  %v376_v50 = vunpack.c.0.s8 %v375_v44  ;;  %v334_v62 = vmul.f32 -0.5, %v997_v53 }
  0x54   :  { %656 = vmatpush3.bf16.msra.mxu0 %v689_v2  ;;  %664 = vmatpush3.bf16.msra.mxu1 %v691_v7  ;;  %v239_v38 = vrot.slane %v234_v36, %v238_v35  ;;  %v243_v39 = vrot.slane %v234_v36, %v242_v37  ;;  %v992_v52 = vld [vmem:[%s1050_s1] sm:$0xff] }
  0x55   :  { %269 = vmatprep.subr.bf16.mxu0 %v694_v18  ;;  %v987_v51 = vsub.s32 %v376_v50, %v973_v34  ;;  %v333_v58 = vmul.f32 -0.5, %v992_v52 }
  0x57   :  { %658 = vmatmul.mubr.msk.bf16.vlgmr.msra.gmra.mrb[0].mxu0 %vm112_vm1, %v88_v5 }
  0x58   :  { %270 = vmatpush1.bf16.msra.mxu0 %v692_v19  ;;  %301 = vmatprep.mubr.bf16.mxu0 %v848_v22 }
  0x59   :  { %271 = vmatprep.subr.bf16.mxu0 %v697_v20 }
  0x5c   :  { %272 = vmatpush1.bf16.msra.mxu0 %v695_v21 }
 0x12a   :  { %v150_v9 = vpop.f32.mrb[0].mxu0 }
 0x12b   :  { %v151_v10 = vadd.f32 %v620_v8, %v150_v9  ;;  %v659_v11 = vpop.f32.mrb[1].mxu0  ;;  %v335_v9 = vmul.f32 %v333_v58, %v992_v52 }
 0x12c   :  { %v153_v12 = vpop.f32.mrb[2].mxu0 }
 0x12d   :  { %v154_v13 = vadd.f32 %v620_v8, %v153_v12  ;;  %v660_v14 = vpop.f32.mrb[3].mxu0  ;;  %v157_v15 = vmax.f32 %v151_v10, 0.0 }
 0x12f   :  { %v158_v16 = vmax.f32 %v154_v13, 0.0  ;;  %v336_v13 = vmul.f32 %v334_v62, %v997_v53 }
 0x131   :  { %v159_v17 = vpack.c.bf16 %v158_v16, %v157_v15 }
 0x133   :  { %666 = vmatmul.mubr.msk.bf16.vlgmr.msra.gmra.mrb[0].mxu1 %vm112_vm1, %v159_v17 }
 0x206   :  { %v220_v24 = vpop.f32.mrb[0].mxu1 }
 0x207   :  { %v221_v25 = vadd.f32 %v624_v23, %v220_v24  ;;  %v667_v26 = vpop.f32.mrb[1].mxu1 }
 0x208   :  { %v223_v27 = vpop.f32.mrb[2].mxu1 }
 0x209   :  { %v224_v28 = vadd.f32 %v624_v23, %v223_v27  ;;  %v668_v29 = vpop.f32.mrb[3].mxu1  ;;  %v227_v30 = vmax.f32 %v221_v25, 0.0 }
 0x20b   :  { %v228_v31 = vmax.f32 %v224_v28, 0.0 }
 0x20d   :  { %v229_v32 = vpack.c.bf16 %v228_v31, %v227_v30 }
 0x20f   :  { %632 = vmatmul.mubr.msk.bf16.vlgmr.msra.gmra.mrb[4].mxu0 %vm112_vm1, %v229_v32 }
 0x2e2   :  { %v303_v40 = vpop.f32.mrb[4].mxu0 }
 0x2e3   :  { %v980_v41 = vadd.f32 %v303_v40, %v239_v38  ;;  %v305_v42 = vpop.f32.mrb[5].mxu0 }
 0x2e4   :  { %v306_v45 = vadd.f32 %v305_v42, %v243_v39  ;;  %v307_v46 = vpop.f32.mrb[6].mxu0 }
 0x2e5   :  { %698 = vtanh.f32 %v980_v41  ;;  %v983_v47 = vadd.f32 %v307_v46, %v239_v38  ;;  %v309_v48 = vpop.f32.mrb[7].mxu0 }
 0x2e6   :  { %700 = vtanh.f32 %v306_v45  ;;  %v310_v49 = vadd.f32 %v309_v48, %v243_v39 }
 0x2e7   :  { %702 = vtanh.f32 %v983_v47 }
 0x2e8   :  { %704 = vtanh.f32 %v310_v49 }
 0x2ef   :  { %v699_v54 = vpop.eup %698 }
 0x2f0   :  { %v701_v55 = vpop.eup %700  ;;  %v373_v56 = vcombine.high %v699_v54, %v699_v54  ;;  %v380_v57 = vrot.slane %v699_v54, %v987_v51  ;;  %635 = vst.sshfl [vmem:[#allocation10] sm:$0x3 pattern:$0x76325410] %v699_v54 }
 0x2f1   :  { %v703_v59 = vpop.eup %702  ;;  %v314_v60 = vadd.f32 1.0, %v701_v55 }
 0x2f2   :  { %v705_v63 = vpop.eup %704  ;;  %v387_v0 = vrot.slane %v373_v56, %v987_v51  ;;  %v388_v1 = vcombine.high %v380_v57, %v380_v57  ;;  %636 = vst.sshfl [vmem:[#allocation10 + $0x10] sm:$0x3 pattern:$0x76325410] %v373_v56  ;;  %v390_v2 = vcombine.high %v703_v59, %v703_v59  ;;  %v397_v3 = vrot.slane %v703_v59, %v987_v51 }
 0x2f3   :  { %637 = vst.sshfl [vmem:[#allocation10 + $0x20] sm:$0x3 pattern:$0x76325410] %v703_v59  ;;  %v316_v4 = vmul.f32 6.0, %v314_v60  ;;  %v315_v5 = vadd.f32 1.0, %v705_v63 }
 0x2f4   :  { %v389_v6 = vcombine.high %v387_v0, %v387_v0  ;;  %416 = vst [vmem:[#allocation10 + $0x8] sm:$0x3] %v388_v1  ;;  %v404_v7 = vrot.slane %v390_v2, %v987_v51  ;;  %v405_v8 = vcombine.high %v397_v3, %v397_v3  ;;  %638 = vst.sshfl [vmem:[#allocation10 + $0x30] sm:$0x3 pattern:$0x76325410] %v390_v2 }
 0x2f5   :  { %v318_v10 = vadd.f32 -10.0, %v316_v4  ;;  %v317_v11 = vmul.f32 6.0, %v315_v5  ;;  %v850_v1 = vmov 269488144   ;;  %v851_v3 = vmov 842150450  }
 0x2f6   :  { %418 = vst [vmem:[#allocation10 + $0x18] sm:$0x3] %v389_v6  ;;  %v406_v12 = vcombine.high %v404_v7, %v404_v7  ;;  %420 = vst [vmem:[#allocation10 + $0x28] sm:$0x3] %v405_v8  ;;  %v530_v2 = vunpack.c.l.s4 %v850_v1  ;;  %v537_v4 = vunpack.c.l.s4 %v851_v3  ;;  %v852_v5 = vmov 1414812756  }
 0x2f7   :  { %v322_v14 = vmul.f32 1.442695, %v318_v10  ;;  %v477_v15 = vcombine.high %v318_v10, %v318_v10  ;;  %v484_v16 = vrot.slane %v318_v10, %v987_v51  ;;  %643 = vst.sshfl [vmem:[#allocation10 + $0x4] sm:$0x3 pattern:$0x76325410] %v318_v10  ;;  %v337_v18 = vsub.f32 %v335_v9, %v318_v10 }
 0x2f8   :  { %v319_v17 = vadd.f32 -10.0, %v317_v11  ;;  %422 = vst [vmem:[#allocation10 + $0x38] sm:$0x3] %v406_v12  ;;  %v544_v6 = vunpack.c.l.s4 %v852_v5  ;;  %v853_v7 = vmov 1987475062   ;;  %v531_v10 = vunpack.c.0.s8 %v530_v2 }
 0x2f9   :  { %706 = vpow2.f32 %v322_v14  ;;  %v491_v19 = vrot.slane %v477_v15, %v987_v51  ;;  %v492_v20 = vcombine.high %v484_v16, %v484_v16  ;;  %644 = vst.sshfl [vmem:[#allocation10 + $0x14] sm:$0x3 pattern:$0x76325410] %v477_v15  ;;  %v339_v24 = vsel %vm332_vm2, %v337_v18, 0.0 }
 0x2fa   :  { %v324_v21 = vmul.f32 1.442695, %v319_v17  ;;  %645 = vst.sshfl [vmem:[#allocation10 + $0x24] sm:$0x3 pattern:$0x76325410] %v319_v17  ;;  %v494_v22 = vcombine.high %v319_v17, %v319_v17  ;;  %v501_v23 = vrot.slane %v319_v17, %v987_v51  ;;  %v338_v25 = vsub.f32 %v336_v13, %v319_v17  ;;  %341 = vadd.xlane.f32.xlu0 %v339_v24 }
 0x2fb   :  { %v493_v26 = vcombine.high %v491_v19, %v491_v19  ;;  %520 = vst [vmem:[#allocation10 + $0xc] sm:$0x3] %v492_v20  ;;  %v551_v8 = vunpack.c.l.s4 %v853_v7  ;;  %v538_v11 = vunpack.c.0.s8 %v537_v4  ;;  %v545_v12 = vunpack.c.0.s8 %v544_v6 }
 0x2fc   :  { %708 = vpow2.f32 %v324_v21  ;;  %v508_v27 = vrot.slane %v494_v22, %v987_v51  ;;  %v509_v28 = vcombine.high %v501_v23, %v501_v23  ;;  %646 = vst.sshfl [vmem:[#allocation10 + $0x34] sm:$0x3 pattern:$0x76325410] %v494_v22  ;;  %v340_v30 = vsel %vm332_vm2, %v338_v25, 0.0 }
 0x2fd   :  { %522 = vst [vmem:[#allocation10 + $0x1c] sm:$0x3] %v493_v26  ;;  %v552_v13 = vunpack.c.0.s8 %v551_v8  ;;  %v534_v14 = vsub.s32 %v531_v10, %v973_v34  ;;  %v541_v61 = vsub.s32 %v538_v11, %v973_v34  ;;  %v548_v17 = vsub.s32 %v545_v12, %v973_v34 }
 0x2fe   :  { %v510_v29 = vcombine.high %v508_v27, %v508_v27  ;;  %524 = vst [vmem:[#allocation10 + $0x2c] sm:$0x3] %v509_v28  ;;  %343 = vadd.xlane.f32.xlu0 %v340_v30 }
 0x2ff   :  { %v555_v18 = vsub.s32 %v552_v13, %v973_v34 }
 0x300   :  { %526 = vst [vmem:[#allocation10 + $0x3c] sm:$0x3] %v510_v29 }
 0x303   :  { %v707_v31 = vpop.eup %706 }
 0x304   :  { %v326_v32 = vmul.f32 %v707_v31, %v992_v52 }
 0x306   :  { %v709_v33 = vpop.eup %708  ;;  %v328_v35 = vadd.f32 %v326_v32, %v980_v41 }
 0x307   :  { %v327_v36 = vmul.f32 %v709_v33, %v997_v53 }
 0x308   :  { %710 = vtanh.f32 %v328_v35 }
 0x309   :  { %v329_v37 = vadd.f32 %v327_v36, %v983_v47 }
 0x30b   :  { %712 = vtanh.f32 %v329_v37 }
 0x312   :  { %v711_v38 = vpop.eup %710 }
 0x313   :  { %v425_v39 = vcombine.high %v711_v38, %v711_v38  ;;  %v432_v40 = vrot.slane %v711_v38, %v987_v51  ;;  %639 = vst.sshfl [vmem:[#allocation10 + $0x2] sm:$0x3 pattern:$0x76325410] %v711_v38  ;;  %v351_v42 = vmul.f32 %v711_v38, %v711_v38 }
 0x315   :  { %v713_v43 = vpop.eup %712  ;;  %v439_v44 = vrot.slane %v425_v39, %v987_v51  ;;  %v440_v45 = vcombine.high %v432_v40, %v432_v40  ;;  %640 = vst.sshfl [vmem:[#allocation10 + $0x12] sm:$0x3 pattern:$0x76325410] %v425_v39  ;;  %v353_v48 = vsub.f32 1.0, %v351_v42 }
 0x316   :  { %v442_v46 = vcombine.high %v713_v43, %v713_v43  ;;  %v449_v41 = vrot.slane %v713_v43, %v987_v51  ;;  %641 = vst.sshfl [vmem:[#allocation10 + $0x22] sm:$0x3 pattern:$0x76325410] %v713_v43  ;;  %v352_v49 = vmul.f32 %v713_v43, %v713_v43 }
 0x317   :  { %v441_v50 = vcombine.high %v439_v44, %v439_v44  ;;  %468 = vst [vmem:[#allocation10 + $0xa] sm:$0x3] %v440_v45  ;;  %v355_v53 = vmax.f32 %v353_v48, 0.0 }
 0x318   :  { %v456_v47 = vrot.slane %v442_v46, %v987_v51  ;;  %v457_v52 = vcombine.high %v449_v41, %v449_v41  ;;  %642 = vst.sshfl [vmem:[#allocation10 + $0x32] sm:$0x3 pattern:$0x76325410] %v442_v46  ;;  %v354_v54 = vsub.f32 1.0, %v352_v49 }
 0x319   :  { %470 = vst [vmem:[#allocation10 + $0x1a] sm:$0x3] %v441_v50  ;;  %v357_v56 = vadd.f32 1e-06, %v355_v53 }
 0x31a   :  { %v458_v55 = vcombine.high %v456_v47, %v456_v47  ;;  %472 = vst [vmem:[#allocation10 + $0x2a] sm:$0x3] %v457_v52  ;;  %v356_v57 = vmax.f32 %v354_v54, 0.0 }
 0x31b   :  { %714 = vlog2.f32 %v357_v56 }
 0x31c   :  { %474 = vst [vmem:[#allocation10 + $0x3a] sm:$0x3] %v458_v55  ;;  %v358_v58 = vadd.f32 1e-06, %v356_v57 }
 0x31e   :  { %716 = vlog2.f32 %v358_v58 }
 0x325   :  { %v715_v59 = vpop.eup %714 }
 0x326   :  { %v360_v60 = vmul.f32 0.6931472, %v715_v59 }
 0x328   :  { %v717_v62 = vpop.eup %716  ;;  %v363_v63 = vsel %vm332_vm2, %v360_v60, 0.0 }
 0x329   :  { %v362_v51 = vmul.f32 0.6931472, %v717_v62  ;;  %365 = vadd.xlane.f32.xlu1 %v363_v63 }
 0x32b   :  { %v364_v0 = vsel %vm332_vm2, %v362_v51, 0.0 }
 0x32d   :  { %367 = vadd.xlane.f32.xlu1 %v364_v0 }
 0x387   :  { %v342_v9 = vpop.xlane.xlu0 %341 }
 0x388   :  { %v633_v15 = vadd.f32 -3.675754, %v342_v9 }
 0x38b   :  { %v344_v16 = vpop.xlane.xlu0 %343 }
 0x38c   :  { %v634_v21 = vadd.f32 -3.675754, %v344_v16 }
 0x3b6   :  { %v366_v19 = vpop.xlane.xlu1 %365 }
 0x3b7   :  { %v369_v20 = vsub.f32 %v633_v15, %v366_v19 }
 0x3b9   :  { %v535_v22 = vrot.slane %v369_v20, %v534_v14  ;;  %v542_v23 = vrot.slane %v369_v20, %v541_v61  ;;  %v549_v24 = vrot.slane %v369_v20, %v548_v17  ;;  %v556_v25 = vrot.slane %v369_v20, %v555_v18 }
 0x3ba   :  { %v368_v26 = vpop.xlane.xlu1 %367 }
 0x3bb   :  { %593 = vst [vmem:[#allocation10 + $0x6] sm:$0x3] %v535_v22  ;;  %594 = vst [vmem:[#allocation10 + $0xe] sm:$0x3] %v542_v23  ;;  %v370_v27 = vsub.f32 %v634_v21, %v368_v26 }
 0x3bc   :  { %595 = vst [vmem:[#allocation10 + $0x16] sm:$0x3] %v549_v24  ;;  %596 = vst [vmem:[#allocation10 + $0x1e] sm:$0x3] %v556_v25 }
 0x3bd   :  { %v563_v28 = vrot.slane %v370_v27, %v534_v14  ;;  %v570_v29 = vrot.slane %v370_v27, %v541_v61  ;;  %v577_v30 = vrot.slane %v370_v27, %v548_v17  ;;  %v584_v31 = vrot.slane %v370_v27, %v555_v18 }
 0x3bf   :  { %597 = vst [vmem:[#allocation10 + $0x26] sm:$0x3] %v563_v28  ;;  %598 = vst [vmem:[#allocation10 + $0x2e] sm:$0x3] %v570_v29 }
 0x3c0   :  { %599 = vst [vmem:[#allocation10 + $0x36] sm:$0x3] %v577_v30  ;;  %600 = vst [vmem:[#allocation10 + $0x3e] sm:$0x3] %v584_v31 }
 0x3c1   :  { %605 = vsyncadd [#allocation4], 896  ;;  %s854_s1 = smov [#allocation10]  }
 0x3c2   :  { %s606_s21 = sshll.u32 %s854_s1, 4  ;;  %s607_s21 = int_to_ptr.vmem [resolvable:$true] %s606_s21 }
 0x3c3   :  { %s806_s22 = scalar_lea.vmem %s607_s21, 128  ;;  %s810_s23 = scalar_lea.vmem %s607_s21, 1024 }
 0x3c4   :  { %p807_p4 = scmp.ne.s32.totalorder %s607_s21, %s806_s22  ;;  %p811_p5 = scmp.lt.s32.totalorder %s607_s21, %s607_s21 }
 0x3c5   :  { %p812_p6 = scmp.lt.s32.totalorder %s810_s23, %s806_s22 }
 0x3c7   :  { %p813_p7 = por %p812_p6, %p811_p5 }
 0x3c9   :  { %p814_p8 = pnand %p813_p7, %p807_p4 }
 0x3cb   :  { %817 = shalt.err (!%p814_p8)
}
 0x3cc   :  { %s818_s20 = scalar_lea.hbm %s1057_s8, 128 }
 0x3cd   :  { %p819_p9 = scmp.ne.s32.totalorder %s1057_s8, %s818_s20  ;;  %p822_p10 = scmp.lt.u32.totalorder %s818_s20, %s1057_s8 }
 0x3cf   :  { %p824_p11 = pnand %p822_p10, %p819_p9 }
 0x3d1   :  { %827 = shalt.err (!%p824_p11)
}
 0x3d2   :  { %612 = dma.vmem_to_hbm [thread:$0]  %s607_s21, 128, %s1057_s8, [#allocation4], %s844_s4, %s844_s4, %s845_s15  }
 0x3d3   :  { %834 = dma.done.wait [#allocation4], 1024  }
 0x3d4   :  { %835 = vsyncadd [#allocation4], 4294966272 }
 0x3d5   :  { %616 = vsyncpa [#allocation3], 1 }
 0x3d6   :  { %617 = vsyncpa [#allocation6], 1 }
 0x3d7   :  { %618 = vsyncpa [#allocation9], 1 }
 0x3d8   :  { %619 = vsyncpa [#allocation4], 1 }

// kernel: tpu_custom_call.1
= control target key start
LH: loop header
LB: loop body
LE: loop exit
PB: predicated region body
PF: predicated region fallthrough
CT: control target
= control target key end

     0   :  { %13 = vsyncpa [#allocation3], 0  ;;  %s1049_s0 = inlined_call_operand.hbm [shape: f32[2,32], index: 0, kind: input, shape index: {}]   ;;  %s1050_s1 = inlined_call_operand.vmem [shape: f32[2,128], index: 1, kind: input, shape index: {}]   ;;  %s1051_s2 = inlined_call_operand.hbm [shape: bf16[32,32], index: 2, kind: input, shape index: {}]   ;;  %s1052_s3 = inlined_call_operand.vmem [shape: f32[1,32], index: 3, kind: input, shape index: {}]   ;;  %s1053_s4 = inlined_call_operand.hbm [shape: bf16[32,32], index: 4, kind: input, shape index: {}]   ;;  %s1054_s5 = inlined_call_operand.vmem [shape: f32[1,32], index: 5, kind: input, shape index: {}]   ;;  %s1055_s6 = inlined_call_operand.hbm [shape: bf16[32,256], index: 6, kind: input, shape index: {}]   ;;  %s1056_s7 = inlined_call_operand.vmem [shape: f32[1,256], index: 7, kind: input, shape index: {}]   ;;  %s1057_s8 = inlined_call_operand.hbm [shape: f32[2,512], index: 8, kind: output, shape index: {}]  }
   0x1   :  { %14 = vsyncpa [#allocation6], 0 }
   0x2   :  { %15 = vsyncpa [#allocation9], 0 }
   0x3   :  { %16 = vsyncpa [#allocation4], 0 }
   0x4   :  { %21 = vsyncadd [#allocation3], 224  ;;  %s836_s27 = smov [#allocation5]   ;;  %s718_s9 = scalar_lea.hbm %s1051_s2, 256 }
   0x5   :  { %s36_s28 = sshll.u32 %s836_s27, 4  ;;  %p719_p0 = scmp.ne.s32.totalorder %s1051_s2, %s718_s9  ;;  %s37_s28 = int_to_ptr.vmem [resolvable:$true] %s36_s28 }
   0x6   :  { %p722_p1 = scmp.lt.u32.totalorder %s718_s9, %s1051_s2 }
   0x8   :  { %p724_p2 = pnand %p722_p1, %p719_p0 }
   0xa   :  { %727 = shalt.err (!%p724_p2)
}
   0xb   :  { %s728_s14 = scalar_lea.vmem %s37_s28, 256  ;;  %p733_p4 = scmp.lt.s32.totalorder %s37_s28, %s37_s28 }
   0xc   :  { %p729_p3 = scmp.ne.s32.totalorder %s37_s28, %s728_s14  ;;  %p734_p5 = scmp.lt.s32.totalorder %s728_s14, %s728_s14 }
   0xe   :  { %p735_p6 = por %p734_p5, %p733_p4 }
  0x10   :  { %p736_p7 = pnand %p735_p6, %p729_p3 }
  0x12   :  { %739 = shalt.err (!%p736_p7)
}
  0x13   :  { %s837_s15 = smov 64   ;;  %s838_s16 = smov 4  }
  0x14   :  { %42 = dma.hbm_to_vmem [thread:$0]  %s1051_s2, 256, %s37_s28, [#allocation6], %s837_s15, %s837_s15, %s838_s16  }
  0x15   :  { %s839_s19 = smov [#allocation2]   ;;  %s740_s23 = scalar_lea.hbm %s1049_s0, 32 }
  0x16   :  { %s22_s20 = sshll.u32 %s839_s19, 4  ;;  %p741_p8 = scmp.ne.s32.totalorder %s1049_s0, %s740_s23  ;;  %s23_s20 = int_to_ptr.vmem [resolvable:$true] %s22_s20 }
  0x17   :  { %p744_p9 = scmp.lt.u32.totalorder %s740_s23, %s1049_s0 }
  0x19   :  { %p746_p10 = pnand %p744_p9, %p741_p8 }
  0x1b   :  { %749 = shalt.err (!%p746_p10)
}
  0x1c   :  { %s750_s29 = scalar_lea.vmem %s23_s20, 32  ;;  %s754_s2 = scalar_lea.vmem %s23_s20, 256 }
  0x1d   :  { %p751_p11 = scmp.ne.s32.totalorder %s23_s20, %s750_s29  ;;  %p755_p12 = scmp.lt.s32.totalorder %s23_s20, %s23_s20 }
  0x1e   :  { %p756_p13 = scmp.lt.s32.totalorder %s754_s2, %s750_s29 }
  0x20   :  { %p757_p0 = por %p756_p13, %p755_p12 }
  0x22   :  { %p758_p1 = pnand %p757_p0, %p751_p11 }
  0x24   :  { %761 = shalt.err (!%p758_p1)
}
  0x25   :  { %s840_s28 = smov 32   ;;  %s841_s30 = smov 2  }
  0x26   :  { %28 = dma.hbm_to_vmem [thread:$0]  %s1049_s0, 32, %s23_s20, [#allocation3], %s840_s28, %s840_s28, %s841_s30  }
  0x27   :  { %s842_s11 = smov [#allocation7]   ;;  %s843_s13 = smov [#allocation8]  }
  0x28   :  { %s50_s12 = sshll.u32 %s842_s11, 4  ;;  %s64_s14 = sshll.u32 %s843_s13, 4  ;;  %s51_s12 = int_to_ptr.vmem [resolvable:$true] %s50_s12  ;;  %s927_s14 = int_to_ptr.vmem [resolvable:$true] %s64_s14 }
  0x29   :  { %s762_s19 = scalar_lea.hbm %s1053_s4, 256 }
  0x2a   :  { %p763_p2 = scmp.ne.s32.totalorder %s1053_s4, %s762_s19  ;;  %p766_p3 = scmp.lt.u32.totalorder %s762_s19, %s1053_s4 }
  0x2c   :  { %p768_p4 = pnand %p766_p3, %p763_p2 }
  0x2e   :  { %771 = shalt.err (!%p768_p4)
}
  0x2f   :  { %s772_s0 = scalar_lea.vmem %s51_s12, 256  ;;  %p777_p6 = scmp.lt.s32.totalorder %s51_s12, %s51_s12 }
  0x30   :  { %p773_p5 = scmp.ne.s32.totalorder %s51_s12, %s772_s0  ;;  %p778_p7 = scmp.lt.s32.totalorder %s772_s0, %s772_s0 }
  0x32   :  { %p779_p8 = por %p778_p7, %p777_p6 }
  0x34   :  { %p780_p9 = pnand %p779_p8, %p773_p5 }
  0x36   :  { %783 = shalt.err (!%p780_p9)
}
  0x37   :  { %56 = dma.hbm_to_vmem [thread:$0]  %s1053_s4, 256, %s51_s12, [#allocation6], %s837_s15, %s837_s15, %s838_s16  }
  0x38   :  { %s784_s29 = scalar_lea.hbm %s1055_s6, 512 }
  0x39   :  { %p785_p10 = scmp.ne.s32.totalorder %s1055_s6, %s784_s29  ;;  %p788_p11 = scmp.lt.u32.totalorder %s784_s29, %s1055_s6 }
  0x3b   :  { %p790_p12 = pnand %p788_p11, %p785_p10 }
  0x3d   :  { %793 = shalt.err (!%p790_p12)
}
  0x3e   :  { %s794_s10 = scalar_lea.vmem %s927_s14, 512  ;;  %p799_p0 = scmp.lt.s32.totalorder %s927_s14, %s927_s14 }
  0x3f   :  { %p795_p13 = scmp.ne.s32.totalorder %s927_s14, %s794_s10  ;;  %p800_p1 = scmp.lt.s32.totalorder %s794_s10, %s794_s10 }
  0x41   :  { %p801_p2 = por %p800_p1, %p799_p0 }
  0x43   :  { %p802_p3 = pnand %p801_p2, %p795_p13 }
  0x45   :  { %805 = shalt.err (!%p802_p3)
}
  0x46   :  { %s844_s4 = smov 128   ;;  %s845_s15 = smov 8  }
  0x47   :  { %70 = dma.hbm_to_vmem [thread:$0]  %s1055_s6, 512, %s927_s14, [#allocation9], %s844_s4, %s844_s4, %s845_s15  }
  0x48   :  { %828 = dma.done.wait [#allocation3], 256  }
  0x49   :  { %829 = vsyncadd [#allocation3], 4294967040 }
  0x4a   :  { %830 = dma.done.wait [#allocation6], 512  }
  0x4b   :  { %831 = vsyncadd [#allocation6], 4294966784 }
  0x4c   :  { %832 = dma.done.wait [#allocation9], 512  }
  0x4d   :  { %833 = vsyncadd [#allocation9], 4294966784  ;;  %v846_v0 = vmov 0.0   ;;  %vm847_vm0 = vmmov 0   ;;  %v688_v1 = vld [vmem:[#allocation5] sm:$0xff]   ;;  %v689_v2 = vld [vmem:[#allocation5 + $0x8] sm:$0xff]   ;;  %v236_v33 = vlaneseq }
  0x4e   :  { %653 = vmatprep.subr.bf16.mxu0 %v846_v0  ;;  %657 = vmatprep.mubr.msk.bf16.mxu0 %vm847_vm0, %v846_v0  ;;  %v86_v3 = vld [vmem:[#allocation2] sm:$0xff]  ;;  %v87_v4 = vld [vmem:[#allocation2 + $0x8] sm:$0xff]  ;;  %vm112_vm1 = vcmask 261120   ;;  %v694_v18 = vld [vmem:[#allocation8 + $0x4] ss:$8 sps:$4 sm:$0xff]   ;;  %v848_v22 = vmov 0  }
  0x4f   :  { %661 = vmatprep.subr.bf16.mxu1 %v846_v0  ;;  %665 = vmatprep.mubr.msk.bf16.mxu1 %vm847_vm0, %v846_v0  ;;  %v88_v5 = vpack.c.bf16 %v87_v4, %v86_v3  ;;  %v690_v6 = vld [vmem:[#allocation7] sm:$0xff]   ;;  %v691_v7 = vld [vmem:[#allocation7 + $0x8] sm:$0xff]   ;;  %v692_v19 = vld [vmem:[#allocation8] ss:$8 sps:$4 sm:$0xff]   ;;  %v973_v34 = vshrl.u32 %v236_v33, 7  ;;  %v1001_v61 = vand.u32 127, %v236_v33 }
  0x50   :  { %654 = vmatpush3.bf16.msra.mxu0 %v688_v1  ;;  %662 = vmatpush3.bf16.msra.mxu1 %v690_v6  ;;  %v620_v8 = vld [vmem:[%s1052_s3] ss:$0 sm:$0xff]  ;;  %v697_v20 = vld [vmem:[#allocation8 + $0x14] ss:$8 sps:$4 sm:$0xff]   ;;  %v849_v43 = vmov 1983009808  }
  0x51   :  { %655 = vmatprep.subr.bf16.mxu0 %v846_v0  ;;  %663 = vmatprep.subr.bf16.mxu1 %v846_v0  ;;  %v695_v21 = vld [vmem:[#allocation8 + $0x10] ss:$8 sps:$4 sm:$0xff]   ;;  %v238_v35 = vsub.s32 0, %v973_v34  ;;  %v242_v37 = vsub.s32 1, %v973_v34  ;;  %v375_v44 = vunpack.c.l.s4 %v849_v43  ;;  %vm332_vm2 = vcmp.lt.s32.totalorder %v1001_v61, 4 }
  0x52   :  { %v624_v23 = vld [vmem:[%s1054_s5] ss:$0 sm:$0xff]  ;;  %v997_v53 = vld [vmem:[%s1050_s1 + $0x8] sm:$0xff] }
  0x53   :  { %v234_v36 = vld [vmem:[%s1056_s7] sm:$0x3]  ;;  %v376_v50 = vunpack.c.0.s8 %v375_v44  ;;  %v334_v62 = vmul.f32 -0.5, %v997_v53 }
  0x54   :  { %656 = vmatpush3.bf16.msra.mxu0 %v689_v2  ;;  %664 = vmatpush3.bf16.msra.mxu1 %v691_v7  ;;  %v239_v38 = vrot.slane %v234_v36, %v238_v35  ;;  %v243_v39 = vrot.slane %v234_v36, %v242_v37  ;;  %v992_v52 = vld [vmem:[%s1050_s1] sm:$0xff] }
  0x55   :  { %269 = vmatprep.subr.bf16.mxu0 %v694_v18  ;;  %v987_v51 = vsub.s32 %v376_v50, %v973_v34  ;;  %v333_v58 = vmul.f32 -0.5, %v992_v52 }
  0x57   :  { %658 = vmatmul.mubr.msk.bf16.vlgmr.msra.gmra.mrb[0].mxu0 %vm112_vm1, %v88_v5 }
  0x58   :  { %270 = vmatpush1.bf16.msra.mxu0 %v692_v19  ;;  %301 = vmatprep.mubr.bf16.mxu0 %v848_v22 }
  0x59   :  { %271 = vmatprep.subr.bf16.mxu0 %v697_v20 }
  0x5c   :  { %272 = vmatpush1.bf16.msra.mxu0 %v695_v21 }
 0x12a   :  { %v150_v9 = vpop.f32.mrb[0].mxu0 }
 0x12b   :  { %v151_v10 = vadd.f32 %v620_v8, %v150_v9  ;;  %v659_v11 = vpop.f32.mrb[1].mxu0  ;;  %v335_v9 = vmul.f32 %v333_v58, %v992_v52 }
 0x12c   :  { %v153_v12 = vpop.f32.mrb[2].mxu0 }
 0x12d   :  { %v154_v13 = vadd.f32 %v620_v8, %v153_v12  ;;  %v660_v14 = vpop.f32.mrb[3].mxu0  ;;  %v157_v15 = vmax.f32 %v151_v10, 0.0 }
 0x12f   :  { %v158_v16 = vmax.f32 %v154_v13, 0.0  ;;  %v336_v13 = vmul.f32 %v334_v62, %v997_v53 }
 0x131   :  { %v159_v17 = vpack.c.bf16 %v158_v16, %v157_v15 }
 0x133   :  { %666 = vmatmul.mubr.msk.bf16.vlgmr.msra.gmra.mrb[0].mxu1 %vm112_vm1, %v159_v17 }
 0x206   :  { %v220_v24 = vpop.f32.mrb[0].mxu1 }
 0x207   :  { %v221_v25 = vadd.f32 %v624_v23, %v220_v24  ;;  %v667_v26 = vpop.f32.mrb[1].mxu1 }
 0x208   :  { %v223_v27 = vpop.f32.mrb[2].mxu1 }
 0x209   :  { %v224_v28 = vadd.f32 %v624_v23, %v223_v27  ;;  %v668_v29 = vpop.f32.mrb[3].mxu1  ;;  %v227_v30 = vmax.f32 %v221_v25, 0.0 }
 0x20b   :  { %v228_v31 = vmax.f32 %v224_v28, 0.0 }
 0x20d   :  { %v229_v32 = vpack.c.bf16 %v228_v31, %v227_v30 }
 0x20f   :  { %632 = vmatmul.mubr.msk.bf16.vlgmr.msra.gmra.mrb[4].mxu0 %vm112_vm1, %v229_v32 }
 0x2e2   :  { %v303_v40 = vpop.f32.mrb[4].mxu0 }
 0x2e3   :  { %v980_v41 = vadd.f32 %v303_v40, %v239_v38  ;;  %v305_v42 = vpop.f32.mrb[5].mxu0 }
 0x2e4   :  { %v306_v45 = vadd.f32 %v305_v42, %v243_v39  ;;  %v307_v46 = vpop.f32.mrb[6].mxu0 }
 0x2e5   :  { %698 = vtanh.f32 %v980_v41  ;;  %v983_v47 = vadd.f32 %v307_v46, %v239_v38  ;;  %v309_v48 = vpop.f32.mrb[7].mxu0 }
 0x2e6   :  { %700 = vtanh.f32 %v306_v45  ;;  %v310_v49 = vadd.f32 %v309_v48, %v243_v39 }
 0x2e7   :  { %702 = vtanh.f32 %v983_v47 }
 0x2e8   :  { %704 = vtanh.f32 %v310_v49 }
 0x2ef   :  { %v699_v54 = vpop.eup %698 }
 0x2f0   :  { %v701_v55 = vpop.eup %700  ;;  %v373_v56 = vcombine.high %v699_v54, %v699_v54  ;;  %v380_v57 = vrot.slane %v699_v54, %v987_v51  ;;  %635 = vst.sshfl [vmem:[#allocation10] sm:$0x3 pattern:$0x76325410] %v699_v54 }
 0x2f1   :  { %v703_v59 = vpop.eup %702  ;;  %v314_v60 = vadd.f32 1.0, %v701_v55 }
 0x2f2   :  { %v705_v63 = vpop.eup %704  ;;  %v387_v0 = vrot.slane %v373_v56, %v987_v51  ;;  %v388_v1 = vcombine.high %v380_v57, %v380_v57  ;;  %636 = vst.sshfl [vmem:[#allocation10 + $0x10] sm:$0x3 pattern:$0x76325410] %v373_v56  ;;  %v390_v2 = vcombine.high %v703_v59, %v703_v59  ;;  %v397_v3 = vrot.slane %v703_v59, %v987_v51 }
 0x2f3   :  { %637 = vst.sshfl [vmem:[#allocation10 + $0x20] sm:$0x3 pattern:$0x76325410] %v703_v59  ;;  %v316_v4 = vmul.f32 6.0, %v314_v60  ;;  %v315_v5 = vadd.f32 1.0, %v705_v63 }
 0x2f4   :  { %v389_v6 = vcombine.high %v387_v0, %v387_v0  ;;  %416 = vst [vmem:[#allocation10 + $0x8] sm:$0x3] %v388_v1  ;;  %v404_v7 = vrot.slane %v390_v2, %v987_v51  ;;  %v405_v8 = vcombine.high %v397_v3, %v397_v3  ;;  %638 = vst.sshfl [vmem:[#allocation10 + $0x30] sm:$0x3 pattern:$0x76325410] %v390_v2 }
 0x2f5   :  { %v318_v10 = vadd.f32 -10.0, %v316_v4  ;;  %v317_v11 = vmul.f32 6.0, %v315_v5  ;;  %v850_v1 = vmov 269488144   ;;  %v851_v3 = vmov 842150450  }
 0x2f6   :  { %418 = vst [vmem:[#allocation10 + $0x18] sm:$0x3] %v389_v6  ;;  %v406_v12 = vcombine.high %v404_v7, %v404_v7  ;;  %420 = vst [vmem:[#allocation10 + $0x28] sm:$0x3] %v405_v8  ;;  %v530_v2 = vunpack.c.l.s4 %v850_v1  ;;  %v537_v4 = vunpack.c.l.s4 %v851_v3  ;;  %v852_v5 = vmov 1414812756  }
 0x2f7   :  { %v322_v14 = vmul.f32 1.442695, %v318_v10  ;;  %v477_v15 = vcombine.high %v318_v10, %v318_v10  ;;  %v484_v16 = vrot.slane %v318_v10, %v987_v51  ;;  %643 = vst.sshfl [vmem:[#allocation10 + $0x4] sm:$0x3 pattern:$0x76325410] %v318_v10  ;;  %v337_v18 = vsub.f32 %v335_v9, %v318_v10 }
 0x2f8   :  { %v319_v17 = vadd.f32 -10.0, %v317_v11  ;;  %422 = vst [vmem:[#allocation10 + $0x38] sm:$0x3] %v406_v12  ;;  %v544_v6 = vunpack.c.l.s4 %v852_v5  ;;  %v853_v7 = vmov 1987475062   ;;  %v531_v10 = vunpack.c.0.s8 %v530_v2 }
 0x2f9   :  { %706 = vpow2.f32 %v322_v14  ;;  %v491_v19 = vrot.slane %v477_v15, %v987_v51  ;;  %v492_v20 = vcombine.high %v484_v16, %v484_v16  ;;  %644 = vst.sshfl [vmem:[#allocation10 + $0x14] sm:$0x3 pattern:$0x76325410] %v477_v15  ;;  %v339_v24 = vsel %vm332_vm2, %v337_v18, 0.0 }
 0x2fa   :  { %v324_v21 = vmul.f32 1.442695, %v319_v17  ;;  %645 = vst.sshfl [vmem:[#allocation10 + $0x24] sm:$0x3 pattern:$0x76325410] %v319_v17  ;;  %v494_v22 = vcombine.high %v319_v17, %v319_v17  ;;  %v501_v23 = vrot.slane %v319_v17, %v987_v51  ;;  %v338_v25 = vsub.f32 %v336_v13, %v319_v17  ;;  %341 = vadd.xlane.f32.xlu0 %v339_v24 }
 0x2fb   :  { %v493_v26 = vcombine.high %v491_v19, %v491_v19  ;;  %520 = vst [vmem:[#allocation10 + $0xc] sm:$0x3] %v492_v20  ;;  %v551_v8 = vunpack.c.l.s4 %v853_v7  ;;  %v538_v11 = vunpack.c.0.s8 %v537_v4  ;;  %v545_v12 = vunpack.c.0.s8 %v544_v6 }
 0x2fc   :  { %708 = vpow2.f32 %v324_v21  ;;  %v508_v27 = vrot.slane %v494_v22, %v987_v51  ;;  %v509_v28 = vcombine.high %v501_v23, %v501_v23  ;;  %646 = vst.sshfl [vmem:[#allocation10 + $0x34] sm:$0x3 pattern:$0x76325410] %v494_v22  ;;  %v340_v30 = vsel %vm332_vm2, %v338_v25, 0.0 }
 0x2fd   :  { %522 = vst [vmem:[#allocation10 + $0x1c] sm:$0x3] %v493_v26  ;;  %v552_v13 = vunpack.c.0.s8 %v551_v8  ;;  %v534_v14 = vsub.s32 %v531_v10, %v973_v34  ;;  %v541_v61 = vsub.s32 %v538_v11, %v973_v34  ;;  %v548_v17 = vsub.s32 %v545_v12, %v973_v34 }
 0x2fe   :  { %v510_v29 = vcombine.high %v508_v27, %v508_v27  ;;  %524 = vst [vmem:[#allocation10 + $0x2c] sm:$0x3] %v509_v28  ;;  %343 = vadd.xlane.f32.xlu0 %v340_v30 }
 0x2ff   :  { %v555_v18 = vsub.s32 %v552_v13, %v973_v34 }
 0x300   :  { %526 = vst [vmem:[#allocation10 + $0x3c] sm:$0x3] %v510_v29 }
 0x303   :  { %v707_v31 = vpop.eup %706 }
 0x304   :  { %v326_v32 = vmul.f32 %v707_v31, %v992_v52 }
 0x306   :  { %v709_v33 = vpop.eup %708  ;;  %v328_v35 = vadd.f32 %v326_v32, %v980_v41 }
 0x307   :  { %v327_v36 = vmul.f32 %v709_v33, %v997_v53 }
 0x308   :  { %710 = vtanh.f32 %v328_v35 }
 0x309   :  { %v329_v37 = vadd.f32 %v327_v36, %v983_v47 }
 0x30b   :  { %712 = vtanh.f32 %v329_v37 }
 0x312   :  { %v711_v38 = vpop.eup %710 }
 0x313   :  { %v425_v39 = vcombine.high %v711_v38, %v711_v38  ;;  %v432_v40 = vrot.slane %v711_v38, %v987_v51  ;;  %639 = vst.sshfl [vmem:[#allocation10 + $0x2] sm:$0x3 pattern:$0x76325410] %v711_v38  ;;  %v351_v42 = vmul.f32 %v711_v38, %v711_v38 }
 0x315   :  { %v713_v43 = vpop.eup %712  ;;  %v439_v44 = vrot.slane %v425_v39, %v987_v51  ;;  %v440_v45 = vcombine.high %v432_v40, %v432_v40  ;;  %640 = vst.sshfl [vmem:[#allocation10 + $0x12] sm:$0x3 pattern:$0x76325410] %v425_v39  ;;  %v353_v48 = vsub.f32 1.0, %v351_v42 }
 0x316   :  { %v442_v46 = vcombine.high %v713_v43, %v713_v43  ;;  %v449_v41 = vrot.slane %v713_v43, %v987_v51  ;;  %641 = vst.sshfl [vmem:[#allocation10 + $0x22] sm:$0x3 pattern:$0x76325410] %v713_v43  ;;  %v352_v49 = vmul.f32 %v713_v43, %v713_v43 }
 0x317   :  { %v441_v50 = vcombine.high %v439_v44, %v439_v44  ;;  %468 = vst [vmem:[#allocation10 + $0xa] sm:$0x3] %v440_v45  ;;  %v355_v53 = vmax.f32 %v353_v48, 0.0 }
 0x318   :  { %v456_v47 = vrot.slane %v442_v46, %v987_v51  ;;  %v457_v52 = vcombine.high %v449_v41, %v449_v41  ;;  %642 = vst.sshfl [vmem:[#allocation10 + $0x32] sm:$0x3 pattern:$0x76325410] %v442_v46  ;;  %v354_v54 = vsub.f32 1.0, %v352_v49 }
 0x319   :  { %470 = vst [vmem:[#allocation10 + $0x1a] sm:$0x3] %v441_v50  ;;  %v357_v56 = vadd.f32 1e-06, %v355_v53 }
 0x31a   :  { %v458_v55 = vcombine.high %v456_v47, %v456_v47  ;;  %472 = vst [vmem:[#allocation10 + $0x2a] sm:$0x3] %v457_v52  ;;  %v356_v57 = vmax.f32 %v354_v54, 0.0 }
 0x31b   :  { %714 = vlog2.f32 %v357_v56 }
 0x31c   :  { %474 = vst [vmem:[#allocation10 + $0x3a] sm:$0x3] %v458_v55  ;;  %v358_v58 = vadd.f32 1e-06, %v356_v57 }
 0x31e   :  { %716 = vlog2.f32 %v358_v58 }
 0x325   :  { %v715_v59 = vpop.eup %714 }
 0x326   :  { %v360_v60 = vmul.f32 0.6931472, %v715_v59 }
 0x328   :  { %v717_v62 = vpop.eup %716  ;;  %v363_v63 = vsel %vm332_vm2, %v360_v60, 0.0 }
 0x329   :  { %v362_v51 = vmul.f32 0.6931472, %v717_v62  ;;  %365 = vadd.xlane.f32.xlu1 %v363_v63 }
 0x32b   :  { %v364_v0 = vsel %vm332_vm2, %v362_v51, 0.0 }
 0x32d   :  { %367 = vadd.xlane.f32.xlu1 %v364_v0 }
 0x387   :  { %v342_v9 = vpop.xlane.xlu0 %341 }
 0x388   :  { %v633_v15 = vadd.f32 -3.675754, %v342_v9 }
 0x38b   :  { %v344_v16 = vpop.xlane.xlu0 %343 }
 0x38c   :  { %v634_v21 = vadd.f32 -3.675754, %v344_v16 }
 0x3b6   :  { %v366_v19 = vpop.xlane.xlu1 %365 }
 0x3b7   :  { %v369_v20 = vsub.f32 %v633_v15, %v366_v19 }
 0x3b9   :  { %v535_v22 = vrot.slane %v369_v20, %v534_v14  ;;  %v542_v23 = vrot.slane %v369_v20, %v541_v61  ;;  %v549_v24 = vrot.slane %v369_v20, %v548_v17  ;;  %v556_v25 = vrot.slane %v369_v20, %v555_v18 }
 0x3ba   :  { %v368_v26 = vpop.xlane.xlu1 %367 }
 0x3bb   :  { %593 = vst [vmem:[#allocation10 + $0x6] sm:$0x3] %v535_v22  ;;  %594 = vst [vmem:[#allocation10 + $0xe] sm:$0x3] %v542_v23  ;;  %v370_v27 = vsub.f32 %v634_v21, %v368_v26 }
 0x3bc   :  { %595 = vst [vmem:[#allocation10 + $0x16] sm:$0x3] %v549_v24  ;;  %596 = vst [vmem:[#allocation10 + $0x1e] sm:$0x3] %v556_v25 }
 0x3bd   :  { %v563_v28 = vrot.slane %v370_v27, %v534_v14  ;;  %v570_v29 = vrot.slane %v370_v27, %v541_v61  ;;  %v577_v30 = vrot.slane %v370_v27, %v548_v17  ;;  %v584_v31 = vrot.slane %v370_v27, %v555_v18 }
 0x3bf   :  { %597 = vst [vmem:[#allocation10 + $0x26] sm:$0x3] %v563_v28  ;;  %598 = vst [vmem:[#allocation10 + $0x2e] sm:$0x3] %v570_v29 }
 0x3c0   :  { %599 = vst [vmem:[#allocation10 + $0x36] sm:$0x3] %v577_v30  ;;  %600 = vst [vmem:[#allocation10 + $0x3e] sm:$0x3] %v584_v31 }
 0x3c1   :  { %605 = vsyncadd [#allocation4], 896  ;;  %s854_s1 = smov [#allocation10]  }
 0x3c2   :  { %s606_s21 = sshll.u32 %s854_s1, 4  ;;  %s607_s21 = int_to_ptr.vmem [resolvable:$true] %s606_s21 }
 0x3c3   :  { %s806_s22 = scalar_lea.vmem %s607_s21, 128  ;;  %s810_s23 = scalar_lea.vmem %s607_s21, 1024 }
 0x3c4   :  { %p807_p4 = scmp.ne.s32.totalorder %s607_s21, %s806_s22  ;;  %p811_p5 = scmp.lt.s32.totalorder %s607_s21, %s607_s21 }
 0x3c5   :  { %p812_p6 = scmp.lt.s32.totalorder %s810_s23, %s806_s22 }
 0x3c7   :  { %p813_p7 = por %p812_p6, %p811_p5 }
 0x3c9   :  { %p814_p8 = pnand %p813_p7, %p807_p4 }
 0x3cb   :  { %817 = shalt.err (!%p814_p8)
}
 0x3cc   :  { %s818_s20 = scalar_lea.hbm %s1057_s8, 128 }
 0x3cd   :  { %p819_p9 = scmp.ne.s32.totalorder %s1057_s8, %s818_s20  ;;  %p822_p10 = scmp.lt.u32.totalorder %s818_s20, %s1057_s8 }
 0x3cf   :  { %p824_p11 = pnand %p822_p10, %p819_p9 }
 0x3d1   :  { %827 = shalt.err (!%p824_p11)
}
 0x3d2   :  { %612 = dma.vmem_to_hbm [thread:$0]  %s607_s21, 128, %s1057_s8, [#allocation4], %s844_s4, %s844_s4, %s845_s15  }
 0x3d3   :  { %834 = dma.done.wait [#allocation4], 1024  }
 0x3d4   :  { %835 = vsyncadd [#allocation4], 4294966272 }
 0x3d5   :  { %616 = vsyncpa [#allocation3], 1 }
 0x3d6   :  { %617 = vsyncpa [#allocation6], 1 }
 0x3d7   :  { %618 = vsyncpa [#allocation9], 1 }
 0x3d8   :  { %619 = vsyncpa [#allocation4], 1 }

</bundles_post_ra>
